<compile_context>
chip_gen: v7x
topology: tpu7x:2x2x1
jax: 0.10.0
libtpu: 0.0.40
codegen_flags: <defaults>
</compile_context>

<pallas_src>
import functools

import jax
import jax.numpy as jnp
from jax.experimental import pallas as pl
from jax.experimental.pallas import tpu as pltpu

EPS = 1e-5


# ---------------------------------------------------------------------------
# In-kernel helpers
# ---------------------------------------------------------------------------
def _conv3x3_rows(x_flat, m_ref, B, H, n_out):
    """3x3 'same' conv of a lane-packed (B*H, W*Cin) tile as three dense MXU
    matmuls against the banded (kw, channel)-folded weights, with the kh row
    taps applied on the output side (per-image zero-filled row shifts):

        out[b, h] = P0[b, h-1] + P1[b, h] + P2[b, h+1],   P_kh = X @ M_kh
    """
    p0 = jnp.dot(x_flat, m_ref[0], preferred_element_type=jnp.float32)
    p1 = jnp.dot(x_flat, m_ref[1], preferred_element_type=jnp.float32)
    p2 = jnp.dot(x_flat, m_ref[2], preferred_element_type=jnp.float32)
    p0 = p0.reshape(B, H, n_out)
    p1 = p1.reshape(B, H, n_out)
    p2 = p2.reshape(B, H, n_out)
    zrow = jnp.zeros((B, 1, n_out), jnp.float32)
    from_above = jnp.concatenate([zrow, p0[:, : H - 1, :]], axis=1)   # P0[h-1]
    from_below = jnp.concatenate([p2[:, 1:, :], zrow], axis=1)        # P2[h+1]
    return p1 + from_above + from_below                               # (B,H,n_out)


def _write_stats(st_ref, acc_flat, n_out):
    """Per-tile [sum, sum_sq] BN partials, padded to an aligned 8-row slab.
    Taken from the f32 accumulator (before any bf16 downcast)."""
    s = jnp.sum(acc_flat, axis=0, keepdims=True)
    sq = jnp.sum(acc_flat * acc_flat, axis=0, keepdims=True)
    st_ref[0] = jnp.concatenate(
        [s, sq, jnp.zeros((6, n_out), jnp.float32)], axis=0)


# ---------------------------------------------------------------------------
# Kernels (grid = (N // B,), one tile of B images per step, "parallel" axis)
# ---------------------------------------------------------------------------
def _conv1_stats_kernel(x_ref, m_ref, y_ref, st_ref, *, B, H, n_out,
                        compute_dtype):
    # x_ref : (B, H, W*Cin)  f32      m_ref : (3, W*Cin, W*Cout) bf16 (resident)
    # y_ref : (B, H, W*Cout) bf16     st_ref: (1, 8, W*Cout) f32 BN1 partials
    x_flat = x_ref[...].reshape(B * H, -1).astype(compute_dtype)
    acc = _conv3x3_rows(x_flat, m_ref, B, H, n_out)
    _write_stats(st_ref, acc.reshape(B * H, n_out), n_out)
    y_ref[...] = acc.astype(y_ref.dtype)


def _bnrelu_conv2_stats_kernel(y1_ref, sc_ref, sh_ref, m_ref, y_ref, st_ref, *,
                               B, H, n_out, compute_dtype):
    # Folded bn1 (scale/shift) + ReLU in f32 (lane-dense VPU), then conv2 +
    # per-tile BN2 statistic partials.
    z = jnp.maximum(
        y1_ref[...].astype(jnp.float32) * sc_ref[...] + sh_ref[...], 0.0)
    z_flat = z.reshape(B * H, -1).astype(compute_dtype)
    acc = _conv3x3_rows(z_flat, m_ref, B, H, n_out)
    _write_stats(st_ref, acc.reshape(B * H, n_out), n_out)
    y_ref[...] = acc.astype(y_ref.dtype)


def _bn2_residual_relu_kernel(y2_ref, x_ref, sc_ref, sh_ref, o_ref):
    # Folded bn2 + residual add + ReLU; purely elementwise, 128-lane dense.
    o_ref[...] = jnp.maximum(
        y2_ref[...].astype(jnp.float32) * sc_ref[...] + sh_ref[...] + x_ref[...],
        0.0)


# ---------------------------------------------------------------------------
# Wrapper-side weight / BN preparation
# ---------------------------------------------------------------------------
def _banded_conv_weight(w_oihw, width, dtype):
    """Fold the kw taps, the channel contraction AND the width zero-halo of a
    3x3 'same' conv into three banded matrices M_kh of shape (W*Cin, W*Cout):

        M_kh[w_in*Cin + c, w_out*Cout + p] = W[p, c, kh, kw]
                                             with w_in = w_out + kw - 1 (in range)

    so that out[h, w_out*Cout + p] = sum_kh x_flat[h + kh - 1, :] @ M_kh, with
    x_flat the *unpadded* lane-packed activation (K = W*Cin, 128-aligned)."""
    cout, cin, kh_sz, kw_sz = w_oihw.shape
    assert kh_sz == 3 and kw_sz == 3
    mats = []
    for kh in range(3):
        a = jnp.zeros((width, cin, width, cout), jnp.float32)
        for kw in range(3):
            off = kw - 1
            lo = max(0, -off)
            hi = width - max(0, off)
            w_out = jnp.arange(lo, hi)
            w_in = w_out + off
            blk = jnp.transpose(w_oihw[:, :, kh, kw])            # (cin, cout)
            a = a.at[w_in, :, w_out, :].add(blk[None, :, :])
        mats.append(a.reshape(width * cin, width * cout))
    return jnp.stack(mats).astype(dtype)                         # (3, W*Cin, W*Cout)


def _finalize_bn(partials, gamma, beta, channels, width, count):
    """Reduce per-tile [sum, sum_sq] partials into folded global training-mode
    BN scale/shift, broadcast to the lane-packed (1, W*C) layout."""
    s = jnp.sum(partials[:, 0, :], axis=0)                       # (W*C,)
    sq = jnp.sum(partials[:, 1, :], axis=0)
    total = jnp.sum(s.reshape(width, channels), axis=0)          # (C,)
    total_sq = jnp.sum(sq.reshape(width, channels), axis=0)
    mean = total / count
    # NOTE: E[x^2] - mean^2 in f32; fine at demo scale — use a shifted/Welford
    # accumulation if N*H*W gets very large.
    var = jnp.maximum(total_sq / count - mean * mean, 0.0)       # biased (training BN)
    scale = gamma.astype(jnp.float32) * jax.lax.rsqrt(var + EPS)
    shift = beta.astype(jnp.float32) - mean * scale
    return jnp.tile(scale, width)[None, :], jnp.tile(shift, width)[None, :]


def _pick_batch_tile(n, h, *, max_rows=512):
    """Largest per-step image count B (divisor of N) with B*H <= max_rows,
    preferring >= 2 grid steps so megacore sharding / pipelining stay alive."""
    divisors = [d for d in range(1, n + 1) if n % d == 0]
    fits = [d for d in divisors if d * h <= max_rows] or [1]
    multi = [d for d in fits if n // d >= 2]
    return max(multi) if multi else max(fits)


# ---------------------------------------------------------------------------
# Public forward
# ---------------------------------------------------------------------------
def basic_block_forward(x_nchw, params, *, mxu_dtype=jnp.bfloat16,
                        inter_dtype=jnp.bfloat16):
    """x_nchw: (N, C, H, W) float32. Returns (N, C, H, W) float32."""
    N, C, H, W = x_nchw.shape
    P = params["w1"].shape[0]
    assert P == C, "downsample=None requires inplanes == planes, stride == 1"
    assert H % 8 == 0, "lane-packed kernel assumes H is a sublane multiple"

    # Lane-packed activations (contiguous reshape): lanes = (w, c), W*C dense.
    # These NCHW<->NHWC transposes only honour the PyTorch NCHW interface; in
    # a full network activations stay channels-last between blocks.
    x = jnp.transpose(x_nchw, (0, 2, 3, 1)).astype(jnp.float32)      # NHWC
    x2d = x.reshape(N, H, W * C)

    m1 = _banded_conv_weight(params["w1"], W, mxu_dtype)
    m2 = _banded_conv_weight(params["w2"], W, mxu_dtype)

    lanes_in = W * C
    lanes_out = W * P
    count = N * H * W
    B = _pick_batch_tile(N, H)
    G = N // B
    par = pltpu.CompilerParams(dimension_semantics=("parallel",))

    act_spec_in = pl.BlockSpec((B, H, lanes_in), lambda g: (g, 0, 0))
    act_spec_out = pl.BlockSpec((B, H, lanes_out), lambda g: (g, 0, 0))
    stat_spec = pl.BlockSpec((1, 8, lanes_out), lambda g: (g, 0, 0))
    vec_spec = pl.BlockSpec((1, lanes_out), lambda g: (0, 0))
    # Constant block index -> weight slab DMA'd once, VMEM-resident across steps.
    def w_spec(k_rows):
        return pl.BlockSpec((3, k_rows, lanes_out), lambda g: (0, 0, 0))

    # ---- pass 1: conv1 + per-tile BN1 statistic partials ---------------------
    y1, st1 = pl.pallas_call(
        functools.partial(_conv1_stats_kernel, B=B, H=H,
                          n_out=lanes_out, compute_dtype=mxu_dtype),
        grid=(G,),
        in_specs=[act_spec_in, w_spec(W * C)],
        out_specs=[act_spec_out, stat_spec],
        out_shape=[
            jax.ShapeDtypeStruct((N, H, lanes_out), inter_dtype),
            jax.ShapeDtypeStruct((G, 8, lanes_out), jnp.float32),
        ],
        compiler_params=par,
    )(x2d, m1)

    sc1, sh1 = _finalize_bn(st1, params["gamma1"], params["beta1"], P, W, count)

    # ---- pass 2: folded bn1 + relu + conv2 + per-tile BN2 partials ------------
    y2, st2 = pl.pallas_call(
        functools.partial(_bnrelu_conv2_stats_kernel, B=B, H=H,
                          n_out=lanes_out, compute_dtype=mxu_dtype),
        grid=(G,),
        in_specs=[act_spec_out, vec_spec, vec_spec, w_spec(W * P)],
        out_specs=[act_spec_out, stat_spec],
        out_shape=[
            jax.ShapeDtypeStruct((N, H, lanes_out), inter_dtype),
            jax.ShapeDtypeStruct((G, 8, lanes_out), jnp.float32),
        ],
        compiler_params=par,
    )(y1, sc1, sh1, m2)

    sc2, sh2 = _finalize_bn(st2, params["gamma2"], params["beta2"], P, W, count)

    # ---- pass 3: folded bn2 + residual + relu ---------------------------------
    out2d = pl.pallas_call(
        _bn2_residual_relu_kernel,
        grid=(G,),
        in_specs=[act_spec_out, act_spec_in, vec_spec, vec_spec],
        out_specs=act_spec_out,
        out_shape=jax.ShapeDtypeStruct((N, H, lanes_out), jnp.float32),
        compiler_params=par,
    )(y2, x2d, sc2, sh2)

    out_nhwc = out2d.reshape(N, H, W, P)
    return jnp.transpose(out_nhwc, (0, 3, 1, 2))                     # -> NCHW


# ---------------------------------------------------------------------------
# Pure-JAX reference (XLA conv) for correctness sanity check
# ---------------------------------------------------------------------------
def _reference_forward(x_nchw, params):
    x = jnp.transpose(x_nchw, (0, 2, 3, 1)).astype(jnp.float32)      # NHWC
    dn = ("NHWC", "HWIO", "NHWC")

    def conv(inp, w_oihw):
        w = jnp.transpose(w_oihw, (2, 3, 1, 0))                      # HWIO
        return jax.lax.conv_general_dilated(inp, w, (1, 1), "SAME",
                                            dimension_numbers=dn)

    def bn(y, g, b):
        m = jnp.mean(y, axis=(0, 1, 2), keepdims=True)
        v = jnp.mean((y - m) ** 2, axis=(0, 1, 2), keepdims=True)
        return (y - m) * jax.lax.rsqrt(v + EPS) * g.reshape(1, 1, 1, -1) \
               + b.reshape(1, 1, 1, -1)

    out = jnp.maximum(bn(conv(x, params["w1"]), params["gamma1"], params["beta1"]), 0.0)
    out = bn(conv(out, params["w2"]), params["gamma2"], params["beta2"])
    out = jnp.maximum(out + x, 0.0)
    return jnp.transpose(out, (0, 3, 1, 2))


if __name__ == "__main__":
    # Small demo: 16 images of 8 channels, 16x16 -> lanes = W*C = 128,
    # batch tile B = 8 -> M = B*H = 128 per MXU matmul, grid = (2,).
    N, C, H, W = 16, 8, 16, 16
    P = C

    key = jax.random.PRNGKey(0)
    k_x, k_w1, k_w2, k_g1, k_b1, k_g2, k_b2 = jax.random.split(key, 7)

    x = jax.random.normal(k_x, (N, C, H, W), dtype=jnp.float32)
    params = {
        "w1": jax.random.normal(k_w1, (P, C, 3, 3), jnp.float32) * (2.0 / (9 * C)) ** 0.5,
        "w2": jax.random.normal(k_w2, (P, P, 3, 3), jnp.float32) * (2.0 / (9 * P)) ** 0.5,
        "gamma1": 1.0 + 0.1 * jax.random.normal(k_g1, (P,), jnp.float32),
        "beta1": 0.1 * jax.random.normal(k_b1, (P,), jnp.float32),
        "gamma2": 1.0 + 0.1 * jax.random.normal(k_g2, (P,), jnp.float32),
        "beta2": 0.1 * jax.random.normal(k_b2, (P,), jnp.float32),
    }

    out = jax.block_until_ready(jax.jit(basic_block_forward)(x, params))
    ref = jax.block_until_ready(_reference_forward(x, params))

    assert out.shape == (N, C, H, W)
    # Convs feed the MXU in bf16 and the y1/y2 intermediates are stored in
    # bf16 (f32 accumulation, f32 BN statistics), so the tolerance accounts
    # for bf16 rounding vs the exact-f32 XLA reference.
    max_err = float(jnp.max(jnp.abs(out - ref)))
    rel_err = float(jnp.linalg.norm(out - ref) / jnp.linalg.norm(ref))
    assert max_err < 1e-1 and rel_err < 2e-2, \
        f"Pallas output mismatch vs reference: max={max_err} rel={rel_err}"
    print("KERNEL_OK")
</pallas_src>

<mosaic_0001>
module attributes {stable_mosaic.version = 11 : i64} {
  func.func @_conv1_stats_kernel(%arg0: i32, %arg1: memref<8x16x128xf32, #tpu.memory_space<vmem>>, %arg2: memref<3x128x128xbf16, #tpu.memory_space<vmem>>, %arg3: memref<8x16x128xbf16, #tpu.memory_space<vmem>>, %arg4: memref<1x8x128xf32, #tpu.memory_space<vmem>>) attributes {dimension_semantics = [#tpu.dimension_semantics<parallel>], iteration_bounds = array<i64: 2>, scalar_prefetch = 0 : i64, scratch_operands = 0 : i64, tpu.core_type = #tpu.core_type<tc>, window_params = [{transform_indices = @transform_0, window_bounds = array<i64: 8, 16, 128>}, {pipeline_mode = #tpu.pipeline_mode<synchronous>, transform_indices = @transform_1, window_bounds = array<i64: 3, 128, 128>}, {transform_indices = @transform_2, window_bounds = array<i64: 8, 16, 128>}, {transform_indices = @transform_3, window_bounds = array<i64: 1, 8, 128>}]} {
    %c0 = arith.constant 0 : index
    %c0_0 = arith.constant 0 : index
    %c0_1 = arith.constant 0 : index
    %0 = vector.load %arg1[%c0, %c0_0, %c0_1] : memref<8x16x128xf32, #tpu.memory_space<vmem>>, vector<8x16x128xf32>
    %1 = vector.shape_cast %0 : vector<8x16x128xf32> to vector<128x128xf32>
    %2 = arith.truncf %1 : vector<128x128xf32> to vector<128x128xbf16>
    %c0_2 = arith.constant 0 : index
    %c0_3 = arith.constant 0 : index
    %c0_4 = arith.constant 0 : index
    %3 = vector.load %arg2[%c0_2, %c0_3, %c0_4] : memref<3x128x128xbf16, #tpu.memory_space<vmem>>, vector<1x128x128xbf16>
    %4 = vector.shape_cast %3 : vector<1x128x128xbf16> to vector<128x128xbf16>
    %cst = arith.constant dense<0.000000e+00> : vector<128x128xf32>
    %5 = tpu.matmul %2, %4, %cst {dimension_numbers = #tpu.dot_dimension_numbers<[1], [0], [0], [1], [0, 0, 1, 1], [], []>} : vector<128x128xbf16>, vector<128x128xbf16>, vector<128x128xf32> -> vector<128x128xf32>
    %c1 = arith.constant 1 : index
    %c0_5 = arith.constant 0 : index
    %c0_6 = arith.constant 0 : index
    %6 = vector.load %arg2[%c1, %c0_5, %c0_6] : memref<3x128x128xbf16, #tpu.memory_space<vmem>>, vector<1x128x128xbf16>
    %7 = vector.shape_cast %6 : vector<1x128x128xbf16> to vector<128x128xbf16>
    %cst_7 = arith.constant dense<0.000000e+00> : vector<128x128xf32>
    %8 = tpu.matmul %2, %7, %cst_7 {dimension_numbers = #tpu.dot_dimension_numbers<[1], [0], [0], [1], [0, 0, 1, 1], [], []>} : vector<128x128xbf16>, vector<128x128xbf16>, vector<128x128xf32> -> vector<128x128xf32>
    %c2 = arith.constant 2 : index
    %c0_8 = arith.constant 0 : index
    %c0_9 = arith.constant 0 : index
    %9 = vector.load %arg2[%c2, %c0_8, %c0_9] : memref<3x128x128xbf16, #tpu.memory_space<vmem>>, vector<1x128x128xbf16>
    %10 = vector.shape_cast %9 : vector<1x128x128xbf16> to vector<128x128xbf16>
    %cst_10 = arith.constant dense<0.000000e+00> : vector<128x128xf32>
    %11 = tpu.matmul %2, %10, %cst_10 {dimension_numbers = #tpu.dot_dimension_numbers<[1], [0], [0], [1], [0, 0, 1, 1], [], []>} : vector<128x128xbf16>, vector<128x128xbf16>, vector<128x128xf32> -> vector<128x128xf32>
    %12 = vector.shape_cast %5 : vector<128x128xf32> to vector<8x16x128xf32>
    %13 = vector.shape_cast %8 : vector<128x128xf32> to vector<8x16x128xf32>
    %14 = vector.shape_cast %11 : vector<128x128xf32> to vector<8x16x128xf32>
    %cst_11 = arith.constant 0.000000e+00 : f32
    %15 = vector.broadcast %cst_11 : f32 to vector<8x1x128xf32>
    %16 = vector.extract_strided_slice %12 {offsets = [0, 0, 0], sizes = [8, 15, 128], strides = [1, 1, 1]} : vector<8x16x128xf32> to vector<8x15x128xf32>
    %17 = tpu.concatenate %15, %16 in 1 : vector<8x1x128xf32>, vector<8x15x128xf32> -> vector<8x16x128xf32>
    %18 = vector.extract_strided_slice %14 {offsets = [0, 1, 0], sizes = [8, 15, 128], strides = [1, 1, 1]} : vector<8x16x128xf32> to vector<8x15x128xf32>
    %19 = tpu.concatenate %18, %15 in 1 : vector<8x15x128xf32>, vector<8x1x128xf32> -> vector<8x16x128xf32>
    %20 = arith.addf %13, %17 : vector<8x16x128xf32>
    %21 = arith.addf %20, %19 : vector<8x16x128xf32>
    %22 = vector.shape_cast %21 : vector<8x16x128xf32> to vector<128x128xf32>
    %cst_12 = arith.constant dense<0.000000e+00> : vector<128xf32>
    %23 = vector.multi_reduction <add>, %22, %cst_12 [0] : vector<128x128xf32> to vector<128xf32>
    %24 = vector.shape_cast %23 : vector<128xf32> to vector<1x128xf32>
    %25 = arith.mulf %22, %22 : vector<128x128xf32>
    %cst_13 = arith.constant dense<0.000000e+00> : vector<128xf32>
    %26 = vector.multi_reduction <add>, %25, %cst_13 [0] : vector<128x128xf32> to vector<128xf32>
    %27 = vector.shape_cast %26 : vector<128xf32> to vector<1x128xf32>
    %cst_14 = arith.constant 0.000000e+00 : f32
    %28 = vector.broadcast %cst_14 : f32 to vector<6x128xf32>
    %29 = tpu.concatenate %24, %27, %28 in 0 : vector<1x128xf32>, vector<1x128xf32>, vector<6x128xf32> -> vector<8x128xf32>
    %c0_15 = arith.constant 0 : index
    %c0_16 = arith.constant 0 : index
    %c0_17 = arith.constant 0 : index
    %30 = vector.load %arg4[%c0_15, %c0_16, %c0_17] : memref<1x8x128xf32, #tpu.memory_space<vmem>>, vector<1x8x128xf32>
    %31 = vector.shape_cast %30 : vector<1x8x128xf32> to vector<8x128xf32>
    %32 = vector.shape_cast %29 : vector<8x128xf32> to vector<1x8x128xf32>
    tpu.vector_store %arg4[%c0_15, %c0_16, %c0_17], %32 {strides = array<i32>} : memref<1x8x128xf32, #tpu.memory_space<vmem>>, vector<1x8x128xf32>,
    %33 = arith.truncf %21 : vector<8x16x128xf32> to vector<8x16x128xbf16>
    %c0_18 = arith.constant 0 : index
    %c0_19 = arith.constant 0 : index
    %c0_20 = arith.constant 0 : index
    %34 = vector.load %arg3[%c0_18, %c0_19, %c0_20] : memref<8x16x128xbf16, #tpu.memory_space<vmem>>, vector<8x16x128xbf16>
    tpu.vector_store %arg3[%c0_18, %c0_19, %c0_20], %33 {strides = array<i32>} : memref<8x16x128xbf16, #tpu.memory_space<vmem>>, vector<8x16x128xbf16>,
    return
  }
  func.func @transform_0(%arg0: i32) -> (i32, i32, i32) {
    %c0_i32 = arith.constant 0 : i32
    %c0_i32_0 = arith.constant 0 : i32
    %c0_i32_1 = arith.constant 0 : i32
    return %arg0, %c0_i32, %c0_i32_0 : i32, i32, i32
  }
  func.func @transform_1(%arg0: i32) -> (i32, i32, i32) {
    %c0_i32 = arith.constant 0 : i32
    %c0_i32_0 = arith.constant 0 : i32
    %c0_i32_1 = arith.constant 0 : i32
    %c0_i32_2 = arith.constant 0 : i32
    return %c0_i32, %c0_i32_0, %c0_i32_1 : i32, i32, i32
  }
  func.func @transform_2(%arg0: i32) -> (i32, i32, i32) {
    %c0_i32 = arith.constant 0 : i32
    %c0_i32_0 = arith.constant 0 : i32
    %c0_i32_1 = arith.constant 0 : i32
    return %arg0, %c0_i32, %c0_i32_0 : i32, i32, i32
  }
  func.func @transform_3(%arg0: i32) -> (i32, i32, i32) {
    %c0_i32 = arith.constant 0 : i32
    %c0_i32_0 = arith.constant 0 : i32
    %c0_i32_1 = arith.constant 0 : i32
    return %arg0, %c0_i32, %c0_i32_0 : i32, i32, i32
  }
}

module attributes {stable_mosaic.version = 11 : i64} {
  func.func @_bnrelu_conv2_stats_kernel(%arg0: i32, %arg1: memref<8x16x128xbf16, #tpu.memory_space<vmem>>, %arg2: memref<1x128xf32, #tpu.memory_space<vmem>>, %arg3: memref<1x128xf32, #tpu.memory_space<vmem>>, %arg4: memref<3x128x128xbf16, #tpu.memory_space<vmem>>, %arg5: memref<8x16x128xbf16, #tpu.memory_space<vmem>>, %arg6: memref<1x8x128xf32, #tpu.memory_space<vmem>>) attributes {dimension_semantics = [#tpu.dimension_semantics<parallel>], iteration_bounds = array<i64: 2>, scalar_prefetch = 0 : i64, scratch_operands = 0 : i64, tpu.core_type = #tpu.core_type<tc>, window_params = [{transform_indices = @transform_0, window_bounds = array<i64: 8, 16, 128>}, {pipeline_mode = #tpu.pipeline_mode<synchronous>, transform_indices = @transform_1, window_bounds = array<i64: 1, 128>}, {pipeline_mode = #tpu.pipeline_mode<synchronous>, transform_indices = @transform_2, window_bounds = array<i64: 1, 128>}, {pipeline_mode = #tpu.pipeline_mode<synchronous>, transform_indices = @transform_3, window_bounds = array<i64: 3, 128, 128>}, {transform_indices = @transform_4, window_bounds = array<i64: 8, 16, 128>}, {transform_indices = @transform_5, window_bounds = array<i64: 1, 8, 128>}]} {
    %c0 = arith.constant 0 : index
    %c0_0 = arith.constant 0 : index
    %c0_1 = arith.constant 0 : index
    %0 = vector.load %arg1[%c0, %c0_0, %c0_1] : memref<8x16x128xbf16, #tpu.memory_space<vmem>>, vector<8x16x128xbf16>
    %1 = arith.extf %0 : vector<8x16x128xbf16> to vector<8x16x128xf32>
    %c0_2 = arith.constant 0 : index
    %c0_3 = arith.constant 0 : index
    %2 = vector.load %arg2[%c0_2, %c0_3] : memref<1x128xf32, #tpu.memory_space<vmem>>, vector<1x128xf32>
    %3 = vector.shape_cast %2 : vector<1x128xf32> to vector<1x1x128xf32>
    %4 = vector.broadcast %3 : vector<1x1x128xf32> to vector<8x16x128xf32>
    %5 = arith.mulf %1, %4 : vector<8x16x128xf32>
    %c0_4 = arith.constant 0 : index
    %c0_5 = arith.constant 0 : index
    %6 = vector.load %arg3[%c0_4, %c0_5] : memref<1x128xf32, #tpu.memory_space<vmem>>, vector<1x128xf32>
    %7 = vector.shape_cast %6 : vector<1x128xf32> to vector<1x1x128xf32>
    %8 = vector.broadcast %7 : vector<1x1x128xf32> to vector<8x16x128xf32>
    %9 = arith.addf %5, %8 : vector<8x16x128xf32>
    %cst = arith.constant 0.000000e+00 : f32
    %10 = vector.broadcast %cst : f32 to vector<8x16x128xf32>
    %11 = arith.maximumf %9, %10 : vector<8x16x128xf32>
    %12 = vector.shape_cast %11 : vector<8x16x128xf32> to vector<128x128xf32>
    %13 = arith.truncf %12 : vector<128x128xf32> to vector<128x128xbf16>
    %c0_6 = arith.constant 0 : index
    %c0_7 = arith.constant 0 : index
    %c0_8 = arith.constant 0 : index
    %14 = vector.load %arg4[%c0_6, %c0_7, %c0_8] : memref<3x128x128xbf16, #tpu.memory_space<vmem>>, vector<1x128x128xbf16>
    %15 = vector.shape_cast %14 : vector<1x128x128xbf16> to vector<128x128xbf16>
    %cst_9 = arith.constant dense<0.000000e+00> : vector<128x128xf32>
    %16 = tpu.matmul %13, %15, %cst_9 {dimension_numbers = #tpu.dot_dimension_numbers<[1], [0], [0], [1], [0, 0, 1, 1], [], []>} : vector<128x128xbf16>, vector<128x128xbf16>, vector<128x128xf32> -> vector<128x128xf32>
    %c1 = arith.constant 1 : index
    %c0_10 = arith.constant 0 : index
    %c0_11 = arith.constant 0 : index
    %17 = vector.load %arg4[%c1, %c0_10, %c0_11] : memref<3x128x128xbf16, #tpu.memory_space<vmem>>, vector<1x128x128xbf16>
    %18 = vector.shape_cast %17 : vector<1x128x128xbf16> to vector<128x128xbf16>
    %cst_12 = arith.constant dense<0.000000e+00> : vector<128x128xf32>
    %19 = tpu.matmul %13, %18, %cst_12 {dimension_numbers = #tpu.dot_dimension_numbers<[1], [0], [0], [1], [0, 0, 1, 1], [], []>} : vector<128x128xbf16>, vector<128x128xbf16>, vector<128x128xf32> -> vector<128x128xf32>
    %c2 = arith.constant 2 : index
    %c0_13 = arith.constant 0 : index
    %c0_14 = arith.constant 0 : index
    %20 = vector.load %arg4[%c2, %c0_13, %c0_14] : memref<3x128x128xbf16, #tpu.memory_space<vmem>>, vector<1x128x128xbf16>
    %21 = vector.shape_cast %20 : vector<1x128x128xbf16> to vector<128x128xbf16>
    %cst_15 = arith.constant dense<0.000000e+00> : vector<128x128xf32>
    %22 = tpu.matmul %13, %21, %cst_15 {dimension_numbers = #tpu.dot_dimension_numbers<[1], [0], [0], [1], [0, 0, 1, 1], [], []>} : vector<128x128xbf16>, vector<128x128xbf16>, vector<128x128xf32> -> vector<128x128xf32>
    %23 = vector.shape_cast %16 : vector<128x128xf32> to vector<8x16x128xf32>
    %24 = vector.shape_cast %19 : vector<128x128xf32> to vector<8x16x128xf32>
    %25 = vector.shape_cast %22 : vector<128x128xf32> to vector<8x16x128xf32>
    %cst_16 = arith.constant 0.000000e+00 : f32
    %26 = vector.broadcast %cst_16 : f32 to vector<8x1x128xf32>
    %27 = vector.extract_strided_slice %23 {offsets = [0, 0, 0], sizes = [8, 15, 128], strides = [1, 1, 1]} : vector<8x16x128xf32> to vector<8x15x128xf32>
    %28 = tpu.concatenate %26, %27 in 1 : vector<8x1x128xf32>, vector<8x15x128xf32> -> vector<8x16x128xf32>
    %29 = vector.extract_strided_slice %25 {offsets = [0, 1, 0], sizes = [8, 15, 128], strides = [1, 1, 1]} : vector<8x16x128xf32> to vector<8x15x128xf32>
    %30 = tpu.concatenate %29, %26 in 1 : vector<8x15x128xf32>, vector<8x1x128xf32> -> vector<8x16x128xf32>
    %31 = arith.addf %24, %28 : vector<8x16x128xf32>
    %32 = arith.addf %31, %30 : vector<8x16x128xf32>
    %33 = vector.shape_cast %32 : vector<8x16x128xf32> to vector<128x128xf32>
    %cst_17 = arith.constant dense<0.000000e+00> : vector<128xf32>
    %34 = vector.multi_reduction <add>, %33, %cst_17 [0] : vector<128x128xf32> to vector<128xf32>
    %35 = vector.shape_cast %34 : vector<128xf32> to vector<1x128xf32>
    %36 = arith.mulf %33, %33 : vector<128x128xf32>
    %cst_18 = arith.constant dense<0.000000e+00> : vector<128xf32>
    %37 = vector.multi_reduction <add>, %36, %cst_18 [0] : vector<128x128xf32> to vector<128xf32>
    %38 = vector.shape_cast %37 : vector<128xf32> to vector<1x128xf32>
    %cst_19 = arith.constant 0.000000e+00 : f32
    %39 = vector.broadcast %cst_19 : f32 to vector<6x128xf32>
    %40 = tpu.concatenate %35, %38, %39 in 0 : vector<1x128xf32>, vector<1x128xf32>, vector<6x128xf32> -> vector<8x128xf32>
    %c0_20 = arith.constant 0 : index
    %c0_21 = arith.constant 0 : index
    %c0_22 = arith.constant 0 : index
    %41 = vector.load %arg6[%c0_20, %c0_21, %c0_22] : memref<1x8x128xf32, #tpu.memory_space<vmem>>, vector<1x8x128xf32>
    %42 = vector.shape_cast %41 : vector<1x8x128xf32> to vector<8x128xf32>
    %43 = vector.shape_cast %40 : vector<8x128xf32> to vector<1x8x128xf32>
    tpu.vector_store %arg6[%c0_20, %c0_21, %c0_22], %43 {strides = array<i32>} : memref<1x8x128xf32, #tpu.memory_space<vmem>>, vector<1x8x128xf32>,
    %44 = arith.truncf %32 : vector<8x16x128xf32> to vector<8x16x128xbf16>
    %c0_23 = arith.constant 0 : index
    %c0_24 = arith.constant 0 : index
    %c0_25 = arith.constant 0 : index
    %45 = vector.load %arg5[%c0_23, %c0_24, %c0_25] : memref<8x16x128xbf16, #tpu.memory_space<vmem>>, vector<8x16x128xbf16>
    tpu.vector_store %arg5[%c0_23, %c0_24, %c0_25], %44 {strides = array<i32>} : memref<8x16x128xbf16, #tpu.memory_space<vmem>>, vector<8x16x128xbf16>,
    return
  }
  func.func @transform_0(%arg0: i32) -> (i32, i32, i32) {
    %c0_i32 = arith.constant 0 : i32
    %c0_i32_0 = arith.constant 0 : i32
    %c0_i32_1 = arith.constant 0 : i32
    return %arg0, %c0_i32, %c0_i32_0 : i32, i32, i32
  }
  func.func @transform_1(%arg0: i32) -> (i32, i32) {
    %c0_i32 = arith.constant 0 : i32
    %c0_i32_0 = arith.constant 0 : i32
    %c0_i32_1 = arith.constant 0 : i32
    return %c0_i32, %c0_i32_0 : i32, i32
  }
  func.func @transform_2(%arg0: i32) -> (i32, i32) {
    %c0_i32 = arith.constant 0 : i32
    %c0_i32_0 = arith.constant 0 : i32
    %c0_i32_1 = arith.constant 0 : i32
    return %c0_i32, %c0_i32_0 : i32, i32
  }
  func.func @transform_3(%arg0: i32) -> (i32, i32, i32) {
    %c0_i32 = arith.constant 0 : i32
    %c0_i32_0 = arith.constant 0 : i32
    %c0_i32_1 = arith.constant 0 : i32
    %c0_i32_2 = arith.constant 0 : i32
    return %c0_i32, %c0_i32_0, %c0_i32_1 : i32, i32, i32
  }
  func.func @transform_4(%arg0: i32) -> (i32, i32, i32) {
    %c0_i32 = arith.constant 0 : i32
    %c0_i32_0 = arith.constant 0 : i32
    %c0_i32_1 = arith.constant 0 : i32
    return %arg0, %c0_i32, %c0_i32_0 : i32, i32, i32
  }
  func.func @transform_5(%arg0: i32) -> (i32, i32, i32) {
    %c0_i32 = arith.constant 0 : i32
    %c0_i32_0 = arith.constant 0 : i32
    %c0_i32_1 = arith.constant 0 : i32
    return %arg0, %c0_i32, %c0_i32_0 : i32, i32, i32
  }
}

module attributes {stable_mosaic.version = 11 : i64} {
  func.func @_bn2_residual_relu_kernel(%arg0: i32, %arg1: memref<8x16x128xbf16, #tpu.memory_space<vmem>>, %arg2: memref<8x16x128xf32, #tpu.memory_space<vmem>>, %arg3: memref<1x128xf32, #tpu.memory_space<vmem>>, %arg4: memref<1x128xf32, #tpu.memory_space<vmem>>, %arg5: memref<8x16x128xf32, #tpu.memory_space<vmem>>) attributes {dimension_semantics = [#tpu.dimension_semantics<parallel>], iteration_bounds = array<i64: 2>, scalar_prefetch = 0 : i64, scratch_operands = 0 : i64, tpu.core_type = #tpu.core_type<tc>, window_params = [{transform_indices = @transform_0, window_bounds = array<i64: 8, 16, 128>}, {transform_indices = @transform_1, window_bounds = array<i64: 8, 16, 128>}, {pipeline_mode = #tpu.pipeline_mode<synchronous>, transform_indices = @transform_2, window_bounds = array<i64: 1, 128>}, {pipeline_mode = #tpu.pipeline_mode<synchronous>, transform_indices = @transform_3, window_bounds = array<i64: 1, 128>}, {transform_indices = @transform_4, window_bounds = array<i64: 8, 16, 128>}]} {
    %c0 = arith.constant 0 : index
    %c0_0 = arith.constant 0 : index
    %c0_1 = arith.constant 0 : index
    %0 = vector.load %arg1[%c0, %c0_0, %c0_1] : memref<8x16x128xbf16, #tpu.memory_space<vmem>>, vector<8x16x128xbf16>
    %1 = arith.extf %0 : vector<8x16x128xbf16> to vector<8x16x128xf32>
    %c0_2 = arith.constant 0 : index
    %c0_3 = arith.constant 0 : index
    %2 = vector.load %arg3[%c0_2, %c0_3] : memref<1x128xf32, #tpu.memory_space<vmem>>, vector<1x128xf32>
    %3 = vector.shape_cast %2 : vector<1x128xf32> to vector<1x1x128xf32>
    %4 = vector.broadcast %3 : vector<1x1x128xf32> to vector<8x16x128xf32>
    %5 = arith.mulf %1, %4 : vector<8x16x128xf32>
    %c0_4 = arith.constant 0 : index
    %c0_5 = arith.constant 0 : index
    %6 = vector.load %arg4[%c0_4, %c0_5] : memref<1x128xf32, #tpu.memory_space<vmem>>, vector<1x128xf32>
    %7 = vector.shape_cast %6 : vector<1x128xf32> to vector<1x1x128xf32>
    %8 = vector.broadcast %7 : vector<1x1x128xf32> to vector<8x16x128xf32>
    %9 = arith.addf %5, %8 : vector<8x16x128xf32>
    %c0_6 = arith.constant 0 : index
    %c0_7 = arith.constant 0 : index
    %c0_8 = arith.constant 0 : index
    %10 = vector.load %arg2[%c0_6, %c0_7, %c0_8] : memref<8x16x128xf32, #tpu.memory_space<vmem>>, vector<8x16x128xf32>
    %11 = arith.addf %9, %10 : vector<8x16x128xf32>
    %cst = arith.constant 0.000000e+00 : f32
    %12 = vector.broadcast %cst : f32 to vector<8x16x128xf32>
    %13 = arith.maximumf %11, %12 : vector<8x16x128xf32>
    %c0_9 = arith.constant 0 : index
    %c0_10 = arith.constant 0 : index
    %c0_11 = arith.constant 0 : index
    %14 = vector.load %arg5[%c0_9, %c0_10, %c0_11] : memref<8x16x128xf32, #tpu.memory_space<vmem>>, vector<8x16x128xf32>
    tpu.vector_store %arg5[%c0_9, %c0_10, %c0_11], %13 {strides = array<i32>} : memref<8x16x128xf32, #tpu.memory_space<vmem>>, vector<8x16x128xf32>,
    return
  }
  func.func @transform_0(%arg0: i32) -> (i32, i32, i32) {
    %c0_i32 = arith.constant 0 : i32
    %c0_i32_0 = arith.constant 0 : i32
    %c0_i32_1 = arith.constant 0 : i32
    return %arg0, %c0_i32, %c0_i32_0 : i32, i32, i32
  }
  func.func @transform_1(%arg0: i32) -> (i32, i32, i32) {
    %c0_i32 = arith.constant 0 : i32
    %c0_i32_0 = arith.constant 0 : i32
    %c0_i32_1 = arith.constant 0 : i32
    return %arg0, %c0_i32, %c0_i32_0 : i32, i32, i32
  }
  func.func @transform_2(%arg0: i32) -> (i32, i32) {
    %c0_i32 = arith.constant 0 : i32
    %c0_i32_0 = arith.constant 0 : i32
    %c0_i32_1 = arith.constant 0 : i32
    return %c0_i32, %c0_i32_0 : i32, i32
  }
  func.func @transform_3(%arg0: i32) -> (i32, i32) {
    %c0_i32 = arith.constant 0 : i32
    %c0_i32_0 = arith.constant 0 : i32
    %c0_i32_1 = arith.constant 0 : i32
    return %c0_i32, %c0_i32_0 : i32, i32
  }
  func.func @transform_4(%arg0: i32) -> (i32, i32, i32) {
    %c0_i32 = arith.constant 0 : i32
    %c0_i32_0 = arith.constant 0 : i32
    %c0_i32_1 = arith.constant 0 : i32
    return %arg0, %c0_i32, %c0_i32_0 : i32, i32, i32
  }
}

</mosaic_0001>

<bundles_post_ra>
// kernel: basic_block_forward.3
= control target key start
LH: loop header
LB: loop body
LE: loop exit
PB: predicated region body
PF: predicated region fallthrough
CT: control target
= control target key end

     0   :  { %s1464_s12 = smov 0   ;;  %s1695_s0 = inlined_call_operand.vmem [shape: f32[16,16,128], index: 0, kind: input, shape index: {}]   ;;  %s1696_s1 = inlined_call_operand.vmem [shape: bf16[3,128,128], index: 1, kind: input, shape index: {}]   ;;  %s1697_s2 = inlined_call_operand.vmem [shape: bf16[16,16,128], index: 2, kind: output, shape index: {0}]   ;;  %s1698_s3 = inlined_call_operand.vmem [shape: f32[2,8,128], index: 3, kind: output, shape index: {1}]  }
   0x1 LB: > { %s1470_s13 = sadd.s32 4294967295, %s1442_s12   ;;  %p1097_p0 = scmp.ge.s32.totalorder %s1442_s12, 1  ;;  %s1442_s12 = sphi %s1464_s12, %s14_s12  }
   0x2   : > { %p142_p1 = scmp.lt.s32.totalorder %s1442_s12, 3 }
   0x4   : > { %p143_p2 = pnand %p1097_p0, %p142_p1 }
   0x5   : > { %v1412_v0 = vld [vmem:[%s1696_s1] sm:$0xff] (!%p143_p2)   ;;  %s1098_s16 = sshll.u32 (!%p143_p2), %s1470_s13, 3  ;;  %v1414_v2 = vld [vmem:[%s1696_s1 + $0x8] sm:$0xff] (!%p143_p2)   ;;  %v1416_v4 = vld [vmem:[%s1696_s1 + $0x10] sm:$0xff] (!%p143_p2)   ;;  %vm716_vm0 = vcmask (!%p143_p2), 1040384   ;;  %vm781_vm1 = vcmask (!%p143_p2), 1046528  }
   0x6   : > { %146 = sbr.rel (%p143_p2) target bundleno = 341 (0x155), region = 28  ;;  %v1413_v1 = vld [vmem:[%s1696_s1 + $0x40] sm:$0xff] (!%p143_p2)   ;;  %1292 = vmatprep.subr.bf16.mxu0 (!%p143_p2), %v1412_v0  ;;  %p173_p3 = scmp.lt.s32.totalorder (!%p143_p2), %s1098_s16, 15  ;;  %v1415_v3 = vld [vmem:[%s1696_s1 + $0x48] sm:$0xff] (!%p143_p2)   ;;  %v1417_v5 = vld [vmem:[%s1696_s1 + $0x50] sm:$0xff] (!%p143_p2)   ;;  %vm921_vm2 = vcmask (!%p143_p2), 1041408  }
   0x7   : > { %1324 = vmatprep.subr.bf16.mxu1 (!%p143_p2), %v1413_v1  ;;  %1293 = vmatpush3.bf16.msra.mxu0 (!%p143_p2), %v1412_v0  ;;  %v1418_v6 = vld [vmem:[%s1696_s1 + $0x18] sm:$0xff] (!%p143_p2)   ;;  %v1420_v8 = vld [vmem:[%s1696_s1 + $0x20] sm:$0xff] (!%p143_p2)   ;;  %v1422_v10 = vld [vmem:[%s1696_s1 + $0x28] sm:$0xff] (!%p143_p2)   ;;  %p186_p4 = scmp.lt.s32.totalorder (!%p143_p2), %s1470_s13, 1 }
   0x8   : > { %1325 = vmatpush3.bf16.msra.mxu1 (!%p143_p2), %v1413_v1  ;;  %1294 = vmatprep.subr.bf16.mxu0 (!%p143_p2), %v1414_v2  ;;  %v1419_v7 = vld [vmem:[%s1696_s1 + $0x58] sm:$0xff] (!%p143_p2)   ;;  %v1421_v9 = vld [vmem:[%s1696_s1 + $0x60] sm:$0xff] (!%p143_p2)   ;;  %v1423_v13 = vld [vmem:[%s1696_s1 + $0x68] sm:$0xff] (!%p143_p2)  }
   0x9   : > { %1326 = vmatprep.subr.bf16.mxu1 (!%p143_p2), %v1415_v3  ;;  %v1424_v15 = vld [vmem:[%s1696_s1 + $0x30] sm:$0xff] (!%p143_p2)   ;;  %v1426_v17 = vld [vmem:[%s1696_s1 + $0x38] sm:$0xff] (!%p143_p2)   ;;  %v1428_v21 = vld [vmem:[%s1696_s1 + $0x80] sm:$0xff] (!%p143_p2)  }
   0xa   : > { %v1425_v16 = vld [vmem:[%s1696_s1 + $0x70] sm:$0xff] (!%p143_p2)   ;;  %v1427_v18 = vld [vmem:[%s1696_s1 + $0x78] sm:$0xff] (!%p143_p2)   ;;  %v1429_v25 = vld [vmem:[%s1696_s1 + $0x88] sm:$0xff] (!%p143_p2)  }
   0xb   : > { %1295 = vmatpush3.bf16.msra.mxu0 (!%p143_p2), %v1414_v2  ;;  %v1430_v29 = vld [vmem:[%s1696_s1 + $0x90] sm:$0xff] (!%p143_p2)   ;;  %v1431_v33 = vld [vmem:[%s1696_s1 + $0x98] sm:$0xff] (!%p143_p2)   ;;  %v1432_v37 = vld [vmem:[%s1696_s1 + $0xa0] sm:$0xff] (!%p143_p2)  }
   0xc   : > { %1327 = vmatpush3.bf16.msra.mxu1 (!%p143_p2), %v1415_v3  ;;  %1296 = vmatprep.subr.bf16.mxu0 (!%p143_p2), %v1416_v4  ;;  %v1433_v41 = vld [vmem:[%s1696_s1 + $0xa8] sm:$0xff] (!%p143_p2)   ;;  %v1434_v45 = vld [vmem:[%s1696_s1 + $0xb0] sm:$0xff] (!%p143_p2)   ;;  %v1435_v47 = vld [vmem:[%s1696_s1 + $0xb8] sm:$0xff] (!%p143_p2)  }
   0xd   : > { %s1700_s16 = smov (!%p173_p3, %s1098_s16), 15  ;;  %1328 = vmatprep.subr.bf16.mxu1 %v1417_v5  ;;  %s1702_s13 = smov (!%p186_p4, %s1470_s13), 1 }
   0xe   : > { %s1179_s4 = sshll.u32 %s1700_s16, 4  ;;  %s1104_s22 = sshll.u32 %s1702_s13, 3 }
   0xf   : > { %1297 = vmatpush3.bf16.msra.mxu0 %v1416_v4  ;;  %s1511_s11 = scalar_lea.vmem %s1695_s0, %s1179_s4  ;;  %s189_s25 = scalar_lea.vmem %s1698_s3, %s1104_s22 }
  0x10   : > { %1329 = vmatpush3.bf16.msra.mxu1 %v1417_v5  ;;  %1298 = vmatprep.subr.bf16.mxu0 %v1418_v6  ;;  %v191_v11 = vld [vmem:[%s1511_s11] sm:$0xff]  ;;  %v192_v12 = vld [vmem:[%s1511_s11 + $0x8] sm:$0xff]  ;;  %v193_v19 = vld [vmem:[%s1511_s11 + $0x10] sm:$0xff] }
  0x11   : > { %1330 = vmatprep.subr.bf16.mxu1 %v1419_v7  ;;  %v1521_v14 = vpack.c.bf16 %v192_v12, %v191_v11  ;;  %v194_v20 = vld [vmem:[%s1511_s11 + $0x18] sm:$0xff]  ;;  %v195_v23 = vld [vmem:[%s1511_s11 + $0x20] sm:$0xff]  ;;  %v196_v24 = vld [vmem:[%s1511_s11 + $0x28] sm:$0xff] }
  0x12   : > { %v1542_v22 = vpack.c.bf16 %v194_v20, %v193_v19  ;;  %v1549_v26 = vpack.c.bf16 %v196_v24, %v195_v23  ;;  %v197_v27 = vld [vmem:[%s1511_s11 + $0x30] sm:$0xff]  ;;  %v198_v28 = vld [vmem:[%s1511_s11 + $0x38] sm:$0xff]  ;;  %v199_v31 = vld [vmem:[%s1511_s11 + $0x40] sm:$0xff] }
  0x13   : > { %1299 = vmatpush3.bf16.msra.mxu0 %v1418_v6  ;;  %1308 = vmatprep.mubr.bf16.mxu0 %v1521_v14  ;;  %v210_v30 = vpack.c.bf16 %v198_v28, %v197_v27  ;;  %v200_v32 = vld [vmem:[%s1511_s11 + $0x48] sm:$0xff]  ;;  %v201_v35 = vld [vmem:[%s1511_s11 + $0x50] sm:$0xff]  ;;  %v202_v36 = vld [vmem:[%s1511_s11 + $0x58] sm:$0xff] }
  0x14   : > { %1331 = vmatpush3.bf16.msra.mxu1 %v1419_v7  ;;  %1300 = vmatprep.subr.bf16.mxu0 %v1420_v8  ;;  %v211_v34 = vpack.c.bf16 %v200_v32, %v199_v31  ;;  %v212_v38 = vpack.c.bf16 %v202_v36, %v201_v35  ;;  %v203_v39 = vld [vmem:[%s1511_s11 + $0x60] sm:$0xff]  ;;  %v204_v40 = vld [vmem:[%s1511_s11 + $0x68] sm:$0xff]  ;;  %v205_v43 = vld [vmem:[%s1511_s11 + $0x70] sm:$0xff] }
  0x15   : > { %1332 = vmatprep.subr.bf16.mxu1 %v1421_v9  ;;  %1340 = vmatprep.mubr.bf16.mxu1 %v1521_v14  ;;  %v213_v42 = vpack.c.bf16 %v204_v40, %v203_v39  ;;  %v206_v44 = vld [vmem:[%s1511_s11 + $0x78] sm:$0xff]  ;;  %s1180_s11 = sshll.u32 %s1700_s16, 3 }
  0x16   : > { %v214_v46 = vpack.c.bf16 %v206_v44, %v205_v43  ;;  %s1640_s16 = scalar_lea.vmem %s1697_s2, %s1180_s11 }
  0x17   : > { %1301 = vmatpush3.bf16.msra.mxu0 %v1420_v8 }
  0x18   : > { %1333 = vmatpush3.bf16.msra.mxu1 %v1421_v9  ;;  %1302 = vmatprep.subr.bf16.mxu0 %v1422_v10 }
  0x19   : > { %1334 = vmatprep.subr.bf16.mxu1 %v1423_v13 }
  0x1b   : > { %1303 = vmatpush3.bf16.msra.mxu0 %v1422_v10 }
  0x1c   : > { %1335 = vmatpush3.bf16.msra.mxu1 %v1423_v13  ;;  %1304 = vmatprep.subr.bf16.mxu0 %v1424_v15 }
  0x1d   : > { %1336 = vmatprep.subr.bf16.mxu1 %v1425_v16 }
  0x1f   : > { %1305 = vmatpush3.bf16.msra.mxu0 %v1424_v15 }
  0x20   : > { %1337 = vmatpush3.bf16.msra.mxu1 %v1425_v16  ;;  %1306 = vmatprep.subr.bf16.mxu0 %v1426_v17 }
  0x21   : > { %1338 = vmatprep.subr.bf16.mxu1 %v1427_v18 }
  0x23   : > { %1307 = vmatpush3.bf16.msra.mxu0 %v1426_v17 }
  0x24   : > { %1339 = vmatpush3.bf16.msra.mxu1 %v1427_v18  ;;  %1356 = vmatprep.subr.bf16.mxu0 %v1428_v21 }
  0x25   : > { %1388 = vmatprep.subr.bf16.mxu1 %v1428_v21 }
  0x26   : > { %1309 = vmatmul.mubr.bf16.vlgmr.msra.gmra.mrb[0].mxu0 %v1542_v22 }
  0x27   : > { %1341 = vmatmul.mubr.bf16.vlgmr.msra.gmra.mrb[0].mxu1 %v1542_v22  ;;  %1357 = vmatpush3.bf16.msra.mxu0 %v1428_v21 }
  0x28   : > { %1396 = vmatpush3.bf16.msra.mxu1 %v1428_v21  ;;  %1358 = vmatprep.subr.bf16.mxu0 %v1429_v25 }
  0x29   : > { %1389 = vmatprep.subr.bf16.mxu1 %v1429_v25  ;;  %1312 = vmatprep.mubr.bf16.mxu0 %v1549_v26 }
  0x2a   : > { %1344 = vmatprep.mubr.bf16.mxu1 %v1549_v26 }
  0x2b   : > { %1359 = vmatpush3.bf16.msra.mxu0 %v1429_v25 }
  0x2c   : > { %1397 = vmatpush3.bf16.msra.mxu1 %v1429_v25  ;;  %1360 = vmatprep.subr.bf16.mxu0 %v1430_v29 }
  0x2d   : > { %1390 = vmatprep.subr.bf16.mxu1 %v1430_v29 }
  0x2e   : > { %1313 = vmatmul.mubr.bf16.gmra.mrb[4].mxu0 %v210_v30 }
  0x2f   : > { %1345 = vmatmul.mubr.bf16.gmra.mrb[4].mxu1 %v210_v30  ;;  %1361 = vmatpush3.bf16.msra.mxu0 %v1430_v29 }
  0x30   : > { %1398 = vmatpush3.bf16.msra.mxu1 %v1430_v29  ;;  %1362 = vmatprep.subr.bf16.mxu0 %v1431_v33 }
  0x31   : > { %1391 = vmatprep.subr.bf16.mxu1 %v1431_v33  ;;  %1316 = vmatprep.mubr.bf16.mxu0 %v211_v34 }
  0x32   : > { %1348 = vmatprep.mubr.bf16.mxu1 %v211_v34 }
  0x33   : > { %1363 = vmatpush3.bf16.msra.mxu0 %v1431_v33 }
  0x34   : > { %1399 = vmatpush3.bf16.msra.mxu1 %v1431_v33  ;;  %1364 = vmatprep.subr.bf16.mxu0 %v1432_v37 }
  0x35   : > { %1392 = vmatprep.subr.bf16.mxu1 %v1432_v37 }
  0x36   : > { %1317 = vmatmul.mubr.bf16.gmra.mrb[8].mxu0 %v212_v38 }
  0x37   : > { %1349 = vmatmul.mubr.bf16.gmra.mrb[8].mxu1 %v212_v38  ;;  %1365 = vmatpush3.bf16.msra.mxu0 %v1432_v37 }
  0x38   : > { %1400 = vmatpush3.bf16.msra.mxu1 %v1432_v37  ;;  %1366 = vmatprep.subr.bf16.mxu0 %v1433_v41 }
  0x39   : > { %1393 = vmatprep.subr.bf16.mxu1 %v1433_v41  ;;  %1320 = vmatprep.mubr.bf16.mxu0 %v213_v42 }
  0x3a   : > { %1352 = vmatprep.mubr.bf16.mxu1 %v213_v42 }
  0x3b   : > { %1367 = vmatpush3.bf16.msra.mxu0 %v1433_v41 }
  0x3c   : > { %1401 = vmatpush3.bf16.msra.mxu1 %v1433_v41  ;;  %1368 = vmatprep.subr.bf16.mxu0 %v1434_v45 }
  0x3d   : > { %1394 = vmatprep.subr.bf16.mxu1 %v1434_v45 }
  0x3e   : > { %1321 = vmatmul.mubr.bf16.gmra.mrb[12].mxu0 %v214_v46 }
  0x3f   : > { %1353 = vmatmul.mubr.bf16.gmra.mrb[12].mxu1 %v214_v46  ;;  %1369 = vmatpush3.bf16.msra.mxu0 %v1434_v45 }
  0x40   : > { %1402 = vmatpush3.bf16.msra.mxu1 %v1434_v45  ;;  %1370 = vmatprep.subr.bf16.mxu0 %v1435_v47 }
  0x41   : > { %1395 = vmatprep.subr.bf16.mxu1 %v1435_v47  ;;  %1372 = vmatprep.mubr.bf16.mxu0 %v1521_v14 }
  0x42   : > { %1380 = vmatprep.mubr.bf16.mxu1 %v211_v34 }
  0x43   : > { %1371 = vmatpush3.bf16.msra.mxu0 %v1435_v47 }
  0x44   : > { %1403 = vmatpush3.bf16.msra.mxu1 %v1435_v47 }
  0x46   : > { %1373 = vmatmul.mubr.bf16.vlgmr.msra.gmra.mrb[16].mxu0 %v1542_v22 }
  0x47   : > { %1381 = vmatmul.mubr.bf16.vlgmr.msra.gmra.mrb[16].mxu1 %v212_v38  ;;  %1376 = vmatprep.mubr.bf16.mxu0 %v1549_v26 }
  0x48   : > { %1384 = vmatprep.mubr.bf16.mxu1 %v213_v42 }
  0x4e   : > { %1377 = vmatmul.mubr.bf16.gmra.mrb[20].mxu0 %v210_v30 }
  0x4f   : > { %1385 = vmatmul.mubr.bf16.gmra.mrb[20].mxu1 %v214_v46 }
  0xf9   : > { %v1310_v48 = vpop.f32.mrb[0].mxu0 }
  0xfa   : > { %v720_v49 = vrot.slane %v1310_v48, 7  ;;  %v313_v50 = vpop.f32.mrb[1].mxu0  ;;  %v1342_v51 = vpop.f32.mrb[0].mxu1 }
  0xfb   : > { %v717_v52 = vrot.slane %v313_v50, 7  ;;  %v1311_v53 = vpop.f32.mrb[2].mxu0  ;;  %v475_v54 = vpop.f32.mrb[1].mxu1 }
  0xfc   : > { %v721_v55 = vrot.slane %v1311_v53, 7  ;;  %v316_v56 = vpop.f32.mrb[3].mxu0  ;;  %v758_v57 = vsel %vm716_vm0, 0.0, %v720_v49  ;;  %v1343_v58 = vpop.f32.mrb[2].mxu1 }
  0xfd   : > { %v718_v59 = vrot.slane %v316_v56, 7  ;;  %v1587_v60 = vadd.f32 %v1342_v51, %v758_v57  ;;  %v757_v61 = vsel %vm716_vm0, 0.0, %v717_v52  ;;  %v478_v62 = vpop.f32.mrb[3].mxu1 }
  0xfe   : > { %v1590_v63 = vadd.f32 %v757_v61, %v475_v54  ;;  %v722_v0 = vsel %vm716_vm0, %v720_v49, %v721_v55 }
  0xff   : > { %v1593_v1 = vadd.f32 %v1343_v58, %v722_v0  ;;  %v719_v2 = vsel %vm716_vm0, %v717_v52, %v718_v59 }
 0x100   : > { %v1596_v3 = vadd.f32 %v719_v2, %v478_v62 }
 0x101   : > { %v1314_v4 = vpop.f32.mrb[4].mxu0 }
 0x102   : > { %v726_v5 = vrot.slane %v1314_v4, 7  ;;  %v329_v6 = vpop.f32.mrb[5].mxu0  ;;  %v1346_v7 = vpop.f32.mrb[4].mxu1 }
 0x103   : > { %v723_v8 = vrot.slane %v329_v6, 7  ;;  %v1315_v9 = vpop.f32.mrb[6].mxu0  ;;  %v491_v10 = vpop.f32.mrb[5].mxu1 }
 0x104   : > { %v727_v11 = vrot.slane %v1315_v9, 7  ;;  %v332_v12 = vpop.f32.mrb[7].mxu0  ;;  %v760_v13 = vsel %vm716_vm0, 0.0, %v726_v5  ;;  %v1347_v14 = vpop.f32.mrb[6].mxu1 }
 0x105   : > { %v724_v15 = vrot.slane %v332_v12, 7  ;;  %v1599_v16 = vadd.f32 %v1346_v7, %v760_v13  ;;  %v759_v17 = vsel %vm716_vm0, 0.0, %v723_v8  ;;  %v494_v18 = vpop.f32.mrb[7].mxu1 }
 0x106   : > { %v1602_v19 = vadd.f32 %v759_v17, %v491_v10  ;;  %v728_v20 = vsel %vm716_vm0, %v726_v5, %v727_v11 }
 0x107   : > { %v1605_v21 = vadd.f32 %v1347_v14, %v728_v20  ;;  %v725_v22 = vsel %vm716_vm0, %v723_v8, %v724_v15 }
 0x108   : > { %v1608_v23 = vadd.f32 %v725_v22, %v494_v18 }
 0x109   : > { %v1318_v24 = vpop.f32.mrb[8].mxu0 }
 0x10a   : > { %v732_v25 = vrot.slane %v1318_v24, 7  ;;  %v345_v26 = vpop.f32.mrb[9].mxu0  ;;  %v1350_v27 = vpop.f32.mrb[8].mxu1 }
 0x10b   : > { %v729_v28 = vrot.slane %v345_v26, 7  ;;  %v1319_v29 = vpop.f32.mrb[10].mxu0  ;;  %v507_v30 = vpop.f32.mrb[9].mxu1 }
 0x10c   : > { %v733_v31 = vrot.slane %v1319_v29, 7  ;;  %v348_v32 = vpop.f32.mrb[11].mxu0  ;;  %v762_v33 = vsel %vm716_vm0, 0.0, %v732_v25  ;;  %v1351_v34 = vpop.f32.mrb[10].mxu1 }
 0x10d   : > { %v730_v35 = vrot.slane %v348_v32, 7  ;;  %v840_v36 = vadd.f32 %v1350_v27, %v762_v33  ;;  %v761_v37 = vsel %vm716_vm0, 0.0, %v729_v28  ;;  %v510_v38 = vpop.f32.mrb[11].mxu1 }
 0x10e   : > { %v1612_v39 = vadd.f32 %v761_v37, %v507_v30  ;;  %v734_v40 = vsel %vm716_vm0, %v732_v25, %v733_v31 }
 0x10f   : > { %v841_v41 = vadd.f32 %v1351_v34, %v734_v40  ;;  %v731_v42 = vsel %vm716_vm0, %v729_v28, %v730_v35 }
 0x110   : > { %v1616_v43 = vadd.f32 %v731_v42, %v510_v38 }
 0x111   : > { %v1322_v44 = vpop.f32.mrb[12].mxu0 }
 0x112   : > { %v738_v45 = vrot.slane %v1322_v44, 7  ;;  %v361_v46 = vpop.f32.mrb[13].mxu0  ;;  %v1354_v47 = vpop.f32.mrb[12].mxu1 }
 0x113   : > { %v735_v48 = vrot.slane %v361_v46, 7  ;;  %v1323_v49 = vpop.f32.mrb[14].mxu0  ;;  %v523_v50 = vpop.f32.mrb[13].mxu1 }
 0x114   : > { %v739_v51 = vrot.slane %v1323_v49, 7  ;;  %v364_v52 = vpop.f32.mrb[15].mxu0  ;;  %v764_v53 = vsel %vm716_vm0, 0.0, %v738_v45  ;;  %v1355_v54 = vpop.f32.mrb[14].mxu1 }
 0x115   : > { %v736_v55 = vrot.slane %v364_v52, 7  ;;  %v1619_v56 = vadd.f32 %v1354_v47, %v764_v53  ;;  %v763_v57 = vsel %vm716_vm0, 0.0, %v735_v48  ;;  %v526_v58 = vpop.f32.mrb[15].mxu1 }
 0x116   : > { %v1622_v59 = vadd.f32 %v763_v57, %v523_v50  ;;  %v740_v61 = vsel %vm716_vm0, %v738_v45, %v739_v51 }
 0x117   : > { %v1625_v62 = vadd.f32 %v1355_v54, %v740_v61  ;;  %v737_v0 = vsel %vm716_vm0, %v735_v48, %v736_v55 }
 0x118   : > { %v1628_v2 = vadd.f32 %v737_v0, %v526_v58 }
 0x119   : > { %v1374_v4 = vpop.f32.mrb[16].mxu0 }
 0x11a   : > { %v1382_v5 = vpop.f32.mrb[16].mxu1  ;;  %v637_v6 = vpop.f32.mrb[17].mxu0  ;;  %v785_v10 = vrot.slane %v1374_v4, 1 }
 0x11b   : > { %v797_v7 = vrot.slane %v1382_v5, 1  ;;  %v669_v8 = vpop.f32.mrb[17].mxu1  ;;  %v1375_v9 = vpop.f32.mrb[18].mxu0  ;;  %v782_v14 = vrot.slane %v637_v6, 1 }
 0x11c   : > { %v786_v11 = vrot.slane %v1375_v9, 1  ;;  %v1383_v12 = vpop.f32.mrb[18].mxu1  ;;  %v640_v13 = vpop.f32.mrb[19].mxu0  ;;  %v794_v20 = vrot.slane %v669_v8, 1 }
 0x11d   : > { %v798_v15 = vrot.slane %v1383_v12, 1  ;;  %v783_v17 = vrot.slane %v640_v13, 1  ;;  %v672_v18 = vpop.f32.mrb[19].mxu1 }
 0x11e   : > { %v787_v22 = vsel %vm781_vm1, %v785_v10, %v786_v11  ;;  %v823_v24 = vsel %vm781_vm1, %v786_v11, 0.0  ;;  %v795_v25 = vrot.slane %v672_v18, 1 }
 0x11f   : > { %v848_v26 = vadd.f32 %v1587_v60, %v787_v22  ;;  %v849_v27 = vadd.f32 %v1593_v1, %v823_v24  ;;  %v799_v28 = vsel %vm781_vm1, %v797_v7, %v798_v15  ;;  %v827_v29 = vsel %vm781_vm1, %v798_v15, 0.0 }
 0x120   : > { %v1642_v30 = vadd.f32 %v840_v36, %v799_v28  ;;  %v1644_v31 = vadd.f32 %v841_v41, %v827_v29  ;;  %v784_v32 = vsel %vm781_vm1, %v782_v14, %v783_v17  ;;  %v822_v60 = vsel %vm781_vm1, %v783_v17, 0.0 }
 0x121   : > { %v1205_v1 = vpack.c.bf16 %v849_v27, %v848_v26  ;;  %v846_v33 = vadd.f32 %v1590_v63, %v784_v32  ;;  %v1378_v34 = vpop.f32.mrb[20].mxu0  ;;  %v847_v37 = vadd.f32 %v1596_v3, %v822_v60  ;;  %v796_v41 = vsel %vm781_vm1, %v794_v20, %v795_v25 }
 0x122   : > { %v1225_v35 = vpack.c.bf16 %v1644_v31, %v1642_v30  ;;  %v1386_v38 = vpop.f32.mrb[20].mxu1  ;;  %v653_v40 = vpop.f32.mrb[21].mxu0  ;;  %v826_v42 = vsel %vm781_vm1, %v795_v25, 0.0  ;;  %v854_v48 = vadd.f32 %v1612_v39, %v796_v41  ;;  %v885_v3 = vmul.f32 %v848_v26, %v848_v26 }
 0x123   : > { %1237 = vst [vmem:[%s1640_s16 + $0x8] sm:$0xff] %v1205_v1   ;;  %v883_v36 = vmul.f32 %v846_v33, %v846_v33  ;;  %v685_v44 = vpop.f32.mrb[21].mxu1  ;;  %v1379_v45 = vpop.f32.mrb[22].mxu0  ;;  %v862_v46 = vadd.f32 %v847_v37, %v846_v33  ;;  %v884_v63 = vmul.f32 %v847_v37, %v847_v37  ;;  %v1200_v47 = vpack.c.bf16 %v847_v37, %v846_v33 }
 0x124   : > { %1241 = vst [vmem:[%s1640_s16 + $0x28] sm:$0xff] %v1225_v35   ;;  %v1387_v49 = vpop.f32.mrb[22].mxu1  ;;  %v656_v50 = vpop.f32.mrb[23].mxu0  ;;  %v855_v51 = vadd.f32 %v1616_v43, %v826_v42  ;;  %v803_v52 = vrot.slane %v1386_v38, 1  ;;  %v791_v57 = vrot.slane %v1378_v34, 1  ;;  %v792_v58 = vrot.slane %v1379_v45, 1 }
 0x125   : > { %v688_v53 = vpop.f32.mrb[23].mxu1  ;;  %v863_v54 = vadd.f32 %v862_v46, %v848_v26  ;;  %v899_v55 = vadd.f32 %v884_v63, %v883_v36  ;;  %1201 = vst [vmem:[%s1640_s16] sm:$0xff] %v1200_v47   ;;  %v788_v0 = vrot.slane %v653_v40, 1  ;;  %v804_v4 = vrot.slane %v1387_v49, 1 }
 0x126   : > { %v1220_v61 = vpack.c.bf16 %v855_v51, %v854_v48  ;;  %v789_v5 = vrot.slane %v656_v50, 1  ;;  %v793_v39 = vsel %vm781_vm1, %v791_v57, %v792_v58  ;;  %v825_v7 = vsel %vm781_vm1, %v792_v58, 0.0 }
 0x127   : > { %v900_v6 = vadd.f32 %v899_v55, %v885_v3  ;;  %v864_v8 = vadd.f32 %v863_v54, %v849_v27  ;;  %v852_v43 = vadd.f32 %v1599_v16, %v793_v39  ;;  %v853_v9 = vadd.f32 %v1605_v21, %v825_v7 }
 0x128   : > { %1240 = vst [vmem:[%s1640_s16 + $0x20] sm:$0xff] %v1220_v61   ;;  %v805_v10 = vsel %vm781_vm1, %v803_v52, %v804_v4  ;;  %v829_v11 = vsel %vm781_vm1, %v804_v4, 0.0  ;;  %v790_v14 = vsel %vm781_vm1, %v788_v0, %v789_v5  ;;  %v824_v15 = vsel %vm781_vm1, %v789_v5, 0.0 }
 0x129   : > { %v860_v12 = vadd.f32 %v1619_v56, %v805_v10  ;;  %v861_v13 = vadd.f32 %v1625_v62, %v829_v11  ;;  %v886_v17 = vmul.f32 %v849_v27, %v849_v27  ;;  %v800_v18 = vrot.slane %v685_v44, 1 }
 0x12a   : > { %v1215_v20 = vpack.c.bf16 %v853_v9, %v852_v43  ;;  %v850_v16 = vadd.f32 %v1602_v19, %v790_v14  ;;  %v851_v22 = vadd.f32 %v1608_v23, %v824_v15  ;;  %v801_v56 = vrot.slane %v688_v53, 1 }
 0x12b   : > { %v1235_v21 = vpack.c.bf16 %v861_v13, %v860_v12  ;;  %v901_v26 = vadd.f32 %v900_v6, %v886_v17  ;;  %v889_v1 = vmul.f32 %v852_v43, %v852_v43  ;;  %v890_v37 = vmul.f32 %v853_v9, %v853_v9 }
 0x12c   : > { %1239 = vst [vmem:[%s1640_s16 + $0x18] sm:$0xff] %v1215_v20   ;;  %v865_v24 = vadd.f32 %v864_v8, %v850_v16  ;;  %v887_v25 = vmul.f32 %v850_v16, %v850_v16  ;;  %v888_v62 = vmul.f32 %v851_v22, %v851_v22  ;;  %v1210_v28 = vpack.c.bf16 %v851_v22, %v850_v16 }
 0x12d   : > { %1243 = vst [vmem:[%s1640_s16 + $0x38] sm:$0xff] %v1235_v21   ;;  %v802_v27 = vsel %vm781_vm1, %v800_v18, %v801_v56  ;;  %v828_v60 = vsel %vm781_vm1, %v801_v56, 0.0  ;;  %v891_v36 = vmul.f32 %v854_v48, %v854_v48  ;;  %v892_v44 = vmul.f32 %v855_v51, %v855_v51 }
 0x12e   : > { %v866_v29 = vadd.f32 %v865_v24, %v851_v22  ;;  %v902_v32 = vadd.f32 %v901_v26, %v887_v25  ;;  %1238 = vst [vmem:[%s1640_s16 + $0x10] sm:$0xff] %v1210_v28   ;;  %v858_v19 = vadd.f32 %v1622_v59, %v802_v27  ;;  %v859_v23 = vadd.f32 %v1628_v2, %v828_v60 }
 0x12f   : > { %v893_v63 = vmul.f32 %v1642_v30, %v1642_v30  ;;  %v894_v47 = vmul.f32 %v1644_v31, %v1644_v31  ;;  %v897_v55 = vmul.f32 %v860_v12, %v860_v12  ;;  %v898_v61 = vmul.f32 %v861_v13, %v861_v13 }
 0x130   : > { %v867_v33 = vadd.f32 %v866_v29, %v852_v43  ;;  %v903_v34 = vadd.f32 %v902_v32, %v888_v62  ;;  %v1230_v35 = vpack.c.bf16 %v859_v23, %v858_v19  ;;  %v895_v52 = vmul.f32 %v858_v19, %v858_v19 }
 0x131   : > { %v896_v54 = vmul.f32 %v859_v23, %v859_v23 }
 0x132   : > { %v868_v38 = vadd.f32 %v867_v33, %v853_v9  ;;  %v904_v40 = vadd.f32 %v903_v34, %v889_v1  ;;  %1242 = vst [vmem:[%s1640_s16 + $0x30] sm:$0xff] %v1230_v35  }
 0x134   : > { %v869_v41 = vadd.f32 %v868_v38, %v854_v48  ;;  %v905_v42 = vadd.f32 %v904_v40, %v890_v37 }
 0x136   : > { %v906_v45 = vadd.f32 %v905_v42, %v891_v36  ;;  %v870_v46 = vadd.f32 %v869_v41, %v855_v51 }
 0x138   : > { %v871_v59 = vadd.f32 %v870_v46, %v1642_v30  ;;  %v907_v2 = vadd.f32 %v906_v45, %v892_v44 }
 0x13a   : > { %v872_v49 = vadd.f32 %v871_v59, %v1644_v31  ;;  %v908_v50 = vadd.f32 %v907_v2, %v893_v63 }
 0x13c   : > { %v873_v3 = vadd.f32 %v872_v49, %v858_v19  ;;  %v909_v48 = vadd.f32 %v908_v50, %v894_v47 }
 0x13e   : > { %v874_v53 = vadd.f32 %v873_v3, %v859_v23  ;;  %v910_v51 = vadd.f32 %v909_v48, %v895_v52 }
 0x140   : > { %v875_v57 = vadd.f32 %v874_v53, %v860_v12  ;;  %v911_v58 = vadd.f32 %v910_v51, %v896_v54 }
 0x142   : > { %v876_v30 = vadd.f32 %v875_v57, %v861_v13  ;;  %v912_v0 = vadd.f32 %v911_v58, %v897_v55 }
 0x144   : > { %v877_v4 = vrot.slane %v876_v30, 4  ;;  %v913_v5 = vadd.f32 %v912_v0, %v898_v61 }
 0x146   : > { %v878_v6 = vadd.f32 %v877_v4, %v876_v30  ;;  %v914_v31 = vrot.slane %v913_v5, 4 }
 0x148   : > { %v879_v39 = vrot.slane %v878_v6, 2  ;;  %v915_v7 = vadd.f32 %v914_v31, %v913_v5 }
 0x14a   : > { %v880_v8 = vadd.f32 %v879_v39, %v878_v6  ;;  %v916_v43 = vrot.slane %v915_v7, 2 }
 0x14c   : > { %v881_v9 = vrot.slane %v880_v8, 1  ;;  %v917_v10 = vadd.f32 %v916_v43, %v915_v7 }
 0x14e   : > { %v918_v11 = vrot.slane %v917_v10, 1  ;;  %v882_v14 = vadd.f32 %v881_v9, %v880_v8 }
 0x150   : > { %v919_v12 = vadd.f32 %v918_v11, %v917_v10 }
 0x152   : > { %v920_v13 = vsel %vm716_vm0, %v882_v14, %v919_v12 }
 0x153   : > { %v922_v15 = vsel %vm921_vm2, %v920_v13, 0.0 }
 0x154   : > { %923 = vst [vmem:[%s189_s25] sm:$0xff] %v922_v15 }
 0x155 PF: > { %s14_s12 = sadd.s32 1, %s1442_s12  }
 0x156   : > { %p11_p5 = scmp.ge.s32.totalorder %s14_s12, 4  }
 0x158   :  { %13 = sbr.rel (!%p11_p5) target bundleno = 1 (0x1), region = 72 }

// kernel: tile.23
= control target key start
LH: loop header
LB: loop body
LE: loop exit
PB: predicated region body
PF: predicated region fallthrough
CT: control target
= control target key end

     0   :  { %s28_s0 = inlined_call_operand.vmem [shape: f32[8], index: 0, kind: input, shape index: {}]   ;;  %s29_s1 = inlined_call_operand.vmem [shape: f32[16,8], index: 1, kind: output, shape index: {}]  }
   0x1   :  { %v4_v0 = vld [vmem:[%s28_s0] ss:$0 sm:$0xff] }
   0x2   :  { %5 = vst [vmem:[%s29_s1] sm:$0xff] %v4_v0  ;;  %8 = vst [vmem:[%s29_s1 + $0x8] sm:$0xff] %v4_v0 }

// kernel: tile.24
= control target key start
LH: loop header
LB: loop body
LE: loop exit
PB: predicated region body
PF: predicated region fallthrough
CT: control target
= control target key end

     0   :  { %s131_s10 = smov 120   ;;  %s132_s11 = smov 104   ;;  %vm3_vm0 = vcmask 64512   ;;  %vm9_vm1 = vcmask 1048512   ;;  %vm15_vm2 = vcmask 982912   ;;  %vm21_vm3 = vcmask 917312   ;;  %s207_s0 = inlined_call_operand.vmem [shape: f32[16,8], index: 0, kind: input, shape index: {}]   ;;  %s208_s1 = inlined_call_operand.vmem [shape: f32[1,128], index: 1, kind: output, shape index: {}]  }
   0x1   :  { %v101_v0 = vld [vmem:[%s207_s0 + $0xf] sm:$0x1]   ;;  %v103_v1 = vld [vmem:[%s207_s0 + $0xd] sm:$0x1]   ;;  %v102_v2 = vld [vmem:[%s207_s0 + $0xe] sm:$0x1]  }
   0x2   :  { %7 = vrot.lane.b32.xlu0 %v101_v0, %s131_s10  ;;  %19 = vrot.lane.b32.xlu1 %v103_v1, %s132_s11  ;;  %v104_v3 = vld [vmem:[%s207_s0 + $0xc] sm:$0x1]   ;;  %s133_s16 = smov 112   ;;  %s134_s17 = smov 96   ;;  %v105_v4 = vld [vmem:[%s207_s0 + $0xb] sm:$0x1]  }
   0x3   :  { %v106_v5 = vld [vmem:[%s207_s0 + $0xa] sm:$0x1]   ;;  %v2_v6 = vld [vmem:[%s207_s0] sm:$0x1]   ;;  %s135_s24 = smov 88   ;;  %s136_s25 = smov 80  }
   0x4   :  { %4 = vst.msk [vmem:[#allocation0] sm:$0x1] %vm3_vm0, %v2_v6   ;;  %v107_v7 = vld [vmem:[%s207_s0 + $0x9] sm:$0x1]   ;;  %v108_v8 = vld [vmem:[%s207_s0 + $0x8] sm:$0x1]  }
   0x5   :  { %s137_s30 = smov 72   ;;  %s138_s2 = smov 64   ;;  %v109_v9 = vld [vmem:[%s207_s0 + $0x7] sm:$0x1]   ;;  %v110_v10 = vld [vmem:[%s207_s0 + $0x6] sm:$0x1]  }
   0x6   :  { %13 = vrot.lane.b32.xlu0 %v102_v2, %s133_s16  ;;  %25 = vrot.lane.b32.xlu1 %v104_v3, %s134_s17  ;;  %s139_s7 = smov 56   ;;  %s140_s8 = smov 48   ;;  %v111_v11 = vld [vmem:[%s207_s0 + $0x5] sm:$0x1]   ;;  %v112_v12 = vld [vmem:[%s207_s0 + $0x4] sm:$0x1]  }
   0x7   :  { %s141_s13 = smov 40   ;;  %s142_s14 = smov 32   ;;  %v113_v13 = vld [vmem:[%s207_s0 + $0x3] sm:$0x1]   ;;  %v114_v14 = vld [vmem:[%s207_s0 + $0x2] sm:$0x1]  }
   0x8   :  { %s143_s19 = smov 24   ;;  %s144_s20 = smov 16   ;;  %v115_v15 = vld [vmem:[%s207_s0 + $0x1] sm:$0x1]   ;;  %vm27_vm4 = vcmask 851712   ;;  %vm33_vm5 = vcmask 786112  }
   0x9   :  { %s145_s0 = smov 8   ;;  %vm39_vm6 = vcmask 720512   ;;  %vm45_vm7 = vcmask 654912   ;;  %vm51_vm8 = vcmask 589312   ;;  %vm57_vm9 = vcmask 523712  }
   0xa   :  { %31 = vrot.lane.b32.xlu0 %v105_v4, %s135_s24  ;;  %37 = vrot.lane.b32.xlu1 %v106_v5, %s136_s25  ;;  %vm63_vm10 = vcmask 458112   ;;  %vm69_vm11 = vcmask 392512   ;;  %vm75_vm12 = vcmask 326912   ;;  %vm81_vm13 = vcmask 261312  }
   0xb   :  { %vm87_vm14 = vcmask 195712   ;;  %vm93_vm15 = vcmask 130112  }
   0xe   :  { %43 = vrot.lane.b32.xlu0 %v107_v7, %s137_s30  ;;  %49 = vrot.lane.b32.xlu1 %v108_v8, %s138_s2 }
  0x12   :  { %55 = vrot.lane.b32.xlu0 %v109_v9, %s139_s7  ;;  %61 = vrot.lane.b32.xlu1 %v110_v10, %s140_s8 }
  0x16   :  { %67 = vrot.lane.b32.xlu0 %v111_v11, %s141_s13  ;;  %73 = vrot.lane.b32.xlu1 %v112_v12, %s142_s14 }
  0x1a   :  { %79 = vrot.lane.b32.xlu0 %v113_v13, %s143_s19  ;;  %85 = vrot.lane.b32.xlu1 %v114_v14, %s144_s20 }
  0x1e   :  { %91 = vrot.lane.b32.xlu0 %v115_v15, %s145_s0 }
  0x74   :  { %v8_v16 = vpop.permute.xlu0 %7   ;;  %v20_v17 = vpop.permute.xlu1 %19  }
  0x75   :  { %10 = vst.msk [vmem:[#allocation0] sm:$0x1] %vm9_vm1, %v8_v16  }
  0x78   :  { %v14_v18 = vpop.permute.xlu0 %13   ;;  %v26_v19 = vpop.permute.xlu1 %25  }
  0x79   :  { %16 = vst.msk [vmem:[#allocation0] sm:$0x1] %vm15_vm2, %v14_v18  }
  0x7a   :  { %22 = vst.msk [vmem:[#allocation0] sm:$0x1] %vm21_vm3, %v20_v17  }
  0x7b   :  { %28 = vst.msk [vmem:[#allocation0] sm:$0x1] %vm27_vm4, %v26_v19  }
  0x7c   :  { %v32_v20 = vpop.permute.xlu0 %31   ;;  %v38_v21 = vpop.permute.xlu1 %37  }
  0x7d   :  { %34 = vst.msk [vmem:[#allocation0] sm:$0x1] %vm33_vm5, %v32_v20  }
  0x7e   :  { %40 = vst.msk [vmem:[#allocation0] sm:$0x1] %vm39_vm6, %v38_v21  }
  0x80   :  { %v44_v22 = vpop.permute.xlu0 %43   ;;  %v50_v23 = vpop.permute.xlu1 %49  }
  0x81   :  { %46 = vst.msk [vmem:[#allocation0] sm:$0x1] %vm45_vm7, %v44_v22  }
  0x82   :  { %52 = vst.msk [vmem:[#allocation0] sm:$0x1] %vm51_vm8, %v50_v23  }
  0x84   :  { %v56_v24 = vpop.permute.xlu0 %55   ;;  %v62_v25 = vpop.permute.xlu1 %61  }
  0x85   :  { %58 = vst.msk [vmem:[#allocation0] sm:$0x1] %vm57_vm9, %v56_v24  }
  0x86   :  { %64 = vst.msk [vmem:[#allocation0] sm:$0x1] %vm63_vm10, %v62_v25  }
  0x88   :  { %v68_v26 = vpop.permute.xlu0 %67   ;;  %v74_v27 = vpop.permute.xlu1 %73  }
  0x89   :  { %70 = vst.msk [vmem:[#allocation0] sm:$0x1] %vm69_vm11, %v68_v26  }
  0x8a   :  { %76 = vst.msk [vmem:[#allocation0] sm:$0x1] %vm75_vm12, %v74_v27  }
  0x8c   :  { %v80_v28 = vpop.permute.xlu0 %79   ;;  %v86_v29 = vpop.permute.xlu1 %85  }
  0x8d   :  { %82 = vst.msk [vmem:[#allocation0] sm:$0x1] %vm81_vm13, %v80_v28  }
  0x8e   :  { %88 = vst.msk [vmem:[#allocation0] sm:$0x1] %vm87_vm14, %v86_v29  }
  0x90   :  { %v92_v30 = vpop.permute.xlu0 %91  }
  0x91   :  { %94 = vst.msk [vmem:[#allocation0] sm:$0x1] %vm93_vm15, %v92_v30  }
  0x98   :  { %v98_v31 = vld [vmem:[#allocation0] sm:$0x1] }
  0x99   :  { %100 = vst [vmem:[%s208_s1] sm:$0x1] %v98_v31 }

// kernel: basic_block_forward.5
= control target key start
LH: loop header
LB: loop body
LE: loop exit
PB: predicated region body
PF: predicated region fallthrough
CT: control target
= control target key end

     0   :  { %s544_s15 = smov 0   ;;  %s660_s0 = inlined_call_operand.vmem [shape: bf16[16,16,128], index: 0, kind: input, shape index: {}]   ;;  %s661_s1 = inlined_call_operand.vmem [shape: f32[16,16,128], index: 1, kind: input, shape index: {}]   ;;  %s662_s2 = inlined_call_operand.vmem [shape: f32[1,128], index: 2, kind: input, shape index: {}]   ;;  %s663_s3 = inlined_call_operand.vmem [shape: f32[1,128], index: 3, kind: input, shape index: {}]   ;;  %s664_s4 = inlined_call_operand.vmem [shape: f32[16,16,128], index: 4, kind: output, shape index: {}]  }
   0x1 LB: > { %s443_s16 = sadd.s32 4294967295, %s517_s15   ;;  %p447_p0 = scmp.ge.s32.totalorder %s517_s15, 1  ;;  %s517_s15 = sphi %s544_s15, %s14_s15  }
   0x2   : > { %p176_p1 = scmp.lt.s32.totalorder %s517_s15, 3 }
   0x4   : > { %p177_p2 = pnand %p447_p0, %p176_p1 }
   0x5   : > { %s448_s17 = sshll.u32 (!%p177_p2), %s443_s16, 3  ;;  %v565_v1 = vld [vmem:[%s662_s2] ss:$0 sm:$0xff] (!%p177_p2) }
   0x6   : > { %180 = sbr.rel (%p177_p2) target bundleno = 41 (0x29), region = 36  ;;  %p211_p3 = scmp.lt.s32.totalorder (!%p177_p2), %s448_s17, 15  ;;  %v578_v5 = vld [vmem:[%s663_s3] ss:$0 sm:$0xff] (!%p177_p2) }
   0xd   : > { %s666_s17 = smov (!%p211_p3, %s448_s17), 15 }
   0xe   : > { %s461_s18 = sshll.u32 %s666_s17, 3  ;;  %s462_s19 = sshll.u32 %s666_s17, 4 }
   0xf   : > { %s559_s22 = scalar_lea.vmem %s660_s0, %s461_s18  ;;  %s572_s27 = scalar_lea.vmem %s661_s1, %s462_s19 }
  0x10   : > { %v465_v0 = vld [vmem:[%s559_s22] sm:$0xff]   ;;  %v496_v4 = vld [vmem:[%s559_s22 + $0x8] sm:$0xff]   ;;  %v497_v8 = vld [vmem:[%s559_s22 + $0x10] sm:$0xff]   ;;  %s609_s6 = scalar_lea.vmem %s664_s4, %s462_s19 }
  0x11   : > { %v466_v2 = vunpack.c.l.bf16 %v465_v0  ;;  %v467_v3 = vunpack.c.h.bf16 %v465_v0  ;;  %v470_v6 = vunpack.c.l.bf16 %v496_v4  ;;  %v471_v7 = vunpack.c.h.bf16 %v496_v4  ;;  %v498_v13 = vld [vmem:[%s559_s22 + $0x18] sm:$0xff]   ;;  %v309_v14 = vld [vmem:[%s572_s27] sm:$0xff]  ;;  %v310_v15 = vld [vmem:[%s572_s27 + $0x8] sm:$0xff] }
  0x12   : > { %v474_v11 = vunpack.c.l.bf16 %v497_v8  ;;  %v475_v12 = vunpack.c.h.bf16 %v497_v8  ;;  %v478_v18 = vunpack.c.l.bf16 %v498_v13  ;;  %v479_v19 = vunpack.c.h.bf16 %v498_v13  ;;  %v311_v22 = vld [vmem:[%s572_s27 + $0x10] sm:$0xff]  ;;  %v312_v23 = vld [vmem:[%s572_s27 + $0x18] sm:$0xff]  ;;  %v313_v28 = vld [vmem:[%s572_s27 + $0x20] sm:$0xff] }
  0x13   : > { %v270_v9 = vmul.f32 %v466_v2, %v565_v1  ;;  %v271_v10 = vmul.f32 %v467_v3, %v565_v1  ;;  %v272_v16 = vmul.f32 %v470_v6, %v565_v1  ;;  %v273_v17 = vmul.f32 %v471_v7, %v565_v1  ;;  %v314_v29 = vld [vmem:[%s572_s27 + $0x28] sm:$0xff]  ;;  %v315_v36 = vld [vmem:[%s572_s27 + $0x30] sm:$0xff]  ;;  %v316_v37 = vld [vmem:[%s572_s27 + $0x38] sm:$0xff] }
  0x14   : > { %v274_v24 = vmul.f32 %v474_v11, %v565_v1  ;;  %v275_v25 = vmul.f32 %v475_v12, %v565_v1  ;;  %v276_v30 = vmul.f32 %v478_v18, %v565_v1  ;;  %v277_v31 = vmul.f32 %v479_v19, %v565_v1  ;;  %v499_v42 = vld [vmem:[%s559_s22 + $0x20] sm:$0xff]   ;;  %v500_v47 = vld [vmem:[%s559_s22 + $0x28] sm:$0xff]   ;;  %v501_v52 = vld [vmem:[%s559_s22 + $0x30] sm:$0xff]  }
  0x15   : > { %v293_v20 = vadd.f32 %v578_v5, %v270_v9  ;;  %v294_v21 = vadd.f32 %v578_v5, %v271_v10  ;;  %v295_v26 = vadd.f32 %v578_v5, %v272_v16  ;;  %v296_v27 = vadd.f32 %v578_v5, %v273_v17  ;;  %v502_v57 = vld [vmem:[%s559_s22 + $0x38] sm:$0xff]   ;;  %v317_v3 = vld [vmem:[%s572_s27 + $0x40] sm:$0xff]  ;;  %v318_v4 = vld [vmem:[%s572_s27 + $0x48] sm:$0xff] }
  0x16   : > { %v297_v34 = vadd.f32 %v578_v5, %v274_v24  ;;  %v298_v35 = vadd.f32 %v578_v5, %v275_v25  ;;  %v299_v40 = vadd.f32 %v578_v5, %v276_v30  ;;  %v300_v41 = vadd.f32 %v578_v5, %v277_v31  ;;  %v319_v12 = vld [vmem:[%s572_s27 + $0x50] sm:$0xff]  ;;  %v320_v13 = vld [vmem:[%s572_s27 + $0x58] sm:$0xff]  ;;  %v321_v18 = vld [vmem:[%s572_s27 + $0x60] sm:$0xff] }
  0x17   : > { %v325_v32 = vadd.f32 %v309_v14, %v293_v20  ;;  %v326_v33 = vadd.f32 %v310_v15, %v294_v21  ;;  %v327_v38 = vadd.f32 %v311_v22, %v295_v26  ;;  %v328_v39 = vadd.f32 %v312_v23, %v296_v27  ;;  %v322_v19 = vld [vmem:[%s572_s27 + $0x68] sm:$0xff]  ;;  %v323_v26 = vld [vmem:[%s572_s27 + $0x70] sm:$0xff]  ;;  %v324_v27 = vld [vmem:[%s572_s27 + $0x78] sm:$0xff] }
  0x18   : > { %v329_v45 = vadd.f32 %v313_v28, %v297_v34  ;;  %v330_v46 = vadd.f32 %v314_v29, %v298_v35  ;;  %v331_v50 = vadd.f32 %v315_v36, %v299_v40  ;;  %v332_v51 = vadd.f32 %v316_v37, %v300_v41 }
  0x19   : > { %v341_v43 = vmax.f32 %v325_v32, 0.0  ;;  %v342_v44 = vmax.f32 %v326_v33, 0.0  ;;  %v343_v48 = vmax.f32 %v327_v38, 0.0  ;;  %v344_v49 = vmax.f32 %v328_v39, 0.0 }
  0x1a   : > { %v345_v53 = vmax.f32 %v329_v45, 0.0  ;;  %v346_v54 = vmax.f32 %v330_v46, 0.0  ;;  %v482_v55 = vunpack.c.l.bf16 %v499_v42  ;;  %v483_v56 = vunpack.c.h.bf16 %v499_v42 }
  0x1b   : > { %357 = vst [vmem:[%s609_s6] sm:$0xff] %v341_v43  ;;  %358 = vst [vmem:[%s609_s6 + $0x8] sm:$0xff] %v342_v44  ;;  %v347_v58 = vmax.f32 %v331_v50, 0.0  ;;  %v348_v59 = vmax.f32 %v332_v51, 0.0  ;;  %v486_v60 = vunpack.c.l.bf16 %v500_v47  ;;  %v487_v61 = vunpack.c.h.bf16 %v500_v47 }
  0x1c   : > { %359 = vst [vmem:[%s609_s6 + $0x10] sm:$0xff] %v343_v48  ;;  %360 = vst [vmem:[%s609_s6 + $0x18] sm:$0xff] %v344_v49  ;;  %v278_v62 = vmul.f32 %v482_v55, %v565_v1  ;;  %v279_v63 = vmul.f32 %v483_v56, %v565_v1  ;;  %v490_v0 = vunpack.c.l.bf16 %v501_v52  ;;  %v491_v2 = vunpack.c.h.bf16 %v501_v52 }
  0x1d   : > { %361 = vst [vmem:[%s609_s6 + $0x20] sm:$0xff] %v345_v53  ;;  %362 = vst [vmem:[%s609_s6 + $0x28] sm:$0xff] %v346_v54  ;;  %v280_v6 = vmul.f32 %v486_v60, %v565_v1  ;;  %v281_v7 = vmul.f32 %v487_v61, %v565_v1  ;;  %v494_v8 = vunpack.c.l.bf16 %v502_v57  ;;  %v495_v9 = vunpack.c.h.bf16 %v502_v57 }
  0x1e   : > { %363 = vst [vmem:[%s609_s6 + $0x30] sm:$0xff] %v347_v58  ;;  %364 = vst [vmem:[%s609_s6 + $0x38] sm:$0xff] %v348_v59  ;;  %v301_v10 = vadd.f32 %v578_v5, %v278_v62  ;;  %v302_v11 = vadd.f32 %v578_v5, %v279_v63  ;;  %v282_v14 = vmul.f32 %v490_v0, %v565_v1 }
  0x1f   : > { %v283_v15 = vmul.f32 %v491_v2, %v565_v1  ;;  %v303_v16 = vadd.f32 %v578_v5, %v280_v6  ;;  %v304_v17 = vadd.f32 %v578_v5, %v281_v7  ;;  %v284_v20 = vmul.f32 %v494_v8, %v565_v1 }
  0x20   : > { %v285_v21 = vmul.f32 %v495_v9, %v565_v1  ;;  %v333_v22 = vadd.f32 %v317_v3, %v301_v10  ;;  %v334_v23 = vadd.f32 %v318_v4, %v302_v11  ;;  %v305_v24 = vadd.f32 %v578_v5, %v282_v14 }
  0x21   : > { %v306_v25 = vadd.f32 %v578_v5, %v283_v15  ;;  %v335_v28 = vadd.f32 %v319_v12, %v303_v16  ;;  %v336_v29 = vadd.f32 %v320_v13, %v304_v17  ;;  %v307_v30 = vadd.f32 %v578_v5, %v284_v20 }
  0x22   : > { %v308_v31 = vadd.f32 %v578_v5, %v285_v21  ;;  %v349_v32 = vmax.f32 %v333_v22, 0.0  ;;  %v350_v1 = vmax.f32 %v334_v23, 0.0  ;;  %v337_v33 = vadd.f32 %v321_v18, %v305_v24 }
  0x23   : > { %v338_v34 = vadd.f32 %v322_v19, %v306_v25  ;;  %v351_v35 = vmax.f32 %v335_v28, 0.0  ;;  %v352_v36 = vmax.f32 %v336_v29, 0.0  ;;  %v339_v37 = vadd.f32 %v323_v26, %v307_v30 }
  0x24   : > { %v340_v38 = vadd.f32 %v324_v27, %v308_v31  ;;  %365 = vst [vmem:[%s609_s6 + $0x40] sm:$0xff] %v349_v32  ;;  %366 = vst [vmem:[%s609_s6 + $0x48] sm:$0xff] %v350_v1  ;;  %v353_v39 = vmax.f32 %v337_v33, 0.0 }
  0x25   : > { %v354_v40 = vmax.f32 %v338_v34, 0.0  ;;  %367 = vst [vmem:[%s609_s6 + $0x50] sm:$0xff] %v351_v35  ;;  %368 = vst [vmem:[%s609_s6 + $0x58] sm:$0xff] %v352_v36  ;;  %v355_v41 = vmax.f32 %v339_v37, 0.0 }
  0x26   : > { %v356_v5 = vmax.f32 %v340_v38, 0.0  ;;  %369 = vst [vmem:[%s609_s6 + $0x60] sm:$0xff] %v353_v39 }
  0x27   : > { %370 = vst [vmem:[%s609_s6 + $0x68] sm:$0xff] %v354_v40  ;;  %371 = vst [vmem:[%s609_s6 + $0x70] sm:$0xff] %v355_v41 }
  0x28   : > { %372 = vst [vmem:[%s609_s6 + $0x78] sm:$0xff] %v356_v5 }
  0x29 PF: > { %s14_s15 = sadd.s32 1, %s517_s15  }
  0x2a   : > { %p11_p4 = scmp.ge.s32.totalorder %s14_s15, 4  }
  0x2c   :  { %13 = sbr.rel (!%p11_p4) target bundleno = 1 (0x1), region = 69 }

// kernel: basic_block_forward.4
= control target key start
LH: loop header
LB: loop body
LE: loop exit
PB: predicated region body
PF: predicated region fallthrough
CT: control target
= control target key end

     0   :  { %s1647_s18 = smov 0   ;;  %s1920_s0 = inlined_call_operand.vmem [shape: bf16[16,16,128], index: 0, kind: input, shape index: {}]   ;;  %s1921_s1 = inlined_call_operand.vmem [shape: f32[1,128], index: 1, kind: input, shape index: {}]   ;;  %s1922_s2 = inlined_call_operand.vmem [shape: f32[1,128], index: 2, kind: input, shape index: {}]   ;;  %s1923_s3 = inlined_call_operand.vmem [shape: bf16[3,128,128], index: 3, kind: input, shape index: {}]   ;;  %s1924_s4 = inlined_call_operand.vmem [shape: bf16[16,16,128], index: 4, kind: output, shape index: {0}]   ;;  %s1925_s5 = inlined_call_operand.vmem [shape: f32[2,8,128], index: 5, kind: output, shape index: {1}]  }
   0x1 LB: > { %s1653_s19 = sadd.s32 4294967295, %s1615_s18   ;;  %p1229_p0 = scmp.ge.s32.totalorder %s1615_s18, 1  ;;  %s1615_s18 = sphi %s1647_s18, %s16_s18  }
   0x2   : > { %p192_p1 = scmp.lt.s32.totalorder %s1615_s18, 3 }
   0x4   : > { %p193_p2 = pnand %p1229_p0, %p192_p1 }
   0x5   : > { %v1585_v0 = vld [vmem:[%s1923_s3] sm:$0xff] (!%p193_p2)   ;;  %s1230_s22 = sshll.u32 (!%p193_p2), %s1653_s19, 3  ;;  %v1587_v2 = vld [vmem:[%s1923_s3 + $0x8] sm:$0xff] (!%p193_p2)   ;;  %v1589_v4 = vld [vmem:[%s1923_s3 + $0x10] sm:$0xff] (!%p193_p2)   ;;  %vm848_vm0 = vcmask (!%p193_p2), 1040384   ;;  %vm913_vm1 = vcmask (!%p193_p2), 1046528  }
   0x6   : > { %196 = sbr.rel (%p193_p2) target bundleno = 341 (0x155), region = 36  ;;  %v1586_v1 = vld [vmem:[%s1923_s3 + $0x40] sm:$0xff] (!%p193_p2)   ;;  %1465 = vmatprep.subr.bf16.mxu0 (!%p193_p2), %v1585_v0  ;;  %p227_p3 = scmp.lt.s32.totalorder (!%p193_p2), %s1230_s22, 15  ;;  %v1588_v3 = vld [vmem:[%s1923_s3 + $0x48] sm:$0xff] (!%p193_p2)   ;;  %v1590_v5 = vld [vmem:[%s1923_s3 + $0x50] sm:$0xff] (!%p193_p2)   ;;  %vm1053_vm2 = vcmask (!%p193_p2), 1041408  }
   0x7   : > { %1497 = vmatprep.subr.bf16.mxu1 (!%p193_p2), %v1586_v1  ;;  %1466 = vmatpush3.bf16.msra.mxu0 (!%p193_p2), %v1585_v0  ;;  %v1591_v6 = vld [vmem:[%s1923_s3 + $0x18] sm:$0xff] (!%p193_p2)   ;;  %v1593_v8 = vld [vmem:[%s1923_s3 + $0x20] sm:$0xff] (!%p193_p2)   ;;  %v1595_v10 = vld [vmem:[%s1923_s3 + $0x28] sm:$0xff] (!%p193_p2)   ;;  %p240_p4 = scmp.lt.s32.totalorder (!%p193_p2), %s1653_s19, 1 }
   0x8   : > { %1498 = vmatpush3.bf16.msra.mxu1 (!%p193_p2), %v1586_v1  ;;  %1467 = vmatprep.subr.bf16.mxu0 (!%p193_p2), %v1587_v2  ;;  %v1592_v7 = vld [vmem:[%s1923_s3 + $0x58] sm:$0xff] (!%p193_p2)   ;;  %v1594_v9 = vld [vmem:[%s1923_s3 + $0x60] sm:$0xff] (!%p193_p2)   ;;  %v1596_v11 = vld [vmem:[%s1923_s3 + $0x68] sm:$0xff] (!%p193_p2)  }
   0x9   : > { %1499 = vmatprep.subr.bf16.mxu1 (!%p193_p2), %v1588_v3  ;;  %v1708_v13 = vld [vmem:[%s1921_s1] ss:$0 sm:$0xff] (!%p193_p2)  ;;  %v1597_v24 = vld [vmem:[%s1923_s3 + $0x30] sm:$0xff] (!%p193_p2)   ;;  %v1599_v42 = vld [vmem:[%s1923_s3 + $0x38] sm:$0xff] (!%p193_p2)  }
   0xa   : > { %v1714_v17 = vld [vmem:[%s1922_s2] ss:$0 sm:$0xff] (!%p193_p2)  ;;  %v1598_v29 = vld [vmem:[%s1923_s3 + $0x70] sm:$0xff] (!%p193_p2)   ;;  %v1600_v46 = vld [vmem:[%s1923_s3 + $0x78] sm:$0xff] (!%p193_p2)  }
   0xb   : > { %1468 = vmatpush3.bf16.msra.mxu0 (!%p193_p2), %v1587_v2  ;;  %v1601_v53 = vld [vmem:[%s1923_s3 + $0x80] sm:$0xff] (!%p193_p2)   ;;  %v1602_v0 = vld [vmem:[%s1923_s3 + $0x88] sm:$0xff] (!%p193_p2)  }
   0xc   : > { %1500 = vmatpush3.bf16.msra.mxu1 (!%p193_p2), %v1588_v3  ;;  %1469 = vmatprep.subr.bf16.mxu0 (!%p193_p2), %v1589_v4 }
   0xd   : > { %s1927_s22 = smov (!%p227_p3, %s1230_s22), 15  ;;  %1501 = vmatprep.subr.bf16.mxu1 %v1590_v5  ;;  %s1929_s19 = smov (!%p240_p4, %s1653_s19), 1 }
   0xe   : > { %s1313_s12 = sshll.u32 %s1927_s22, 3  ;;  %s1236_s22 = sshll.u32 %s1929_s19, 3 }
   0xf   : > { %1470 = vmatpush3.bf16.msra.mxu0 %v1589_v4  ;;  %s1696_s21 = scalar_lea.vmem %s1920_s0, %s1313_s12  ;;  %s1865_s11 = scalar_lea.vmem %s1924_s4, %s1313_s12 }
  0x10   : > { %1502 = vmatpush3.bf16.msra.mxu1 %v1590_v5  ;;  %1471 = vmatprep.subr.bf16.mxu0 %v1591_v6  ;;  %v1332_v12 = vld [vmem:[%s1696_s21] sm:$0xff]   ;;  %v1403_v16 = vld [vmem:[%s1696_s21 + $0x8] sm:$0xff]   ;;  %v1404_v22 = vld [vmem:[%s1696_s21 + $0x10] sm:$0xff]   ;;  %s243_s14 = scalar_lea.vmem %s1925_s5, %s1236_s22 }
  0x11   : > { %1503 = vmatprep.subr.bf16.mxu1 %v1592_v7  ;;  %v1333_v14 = vunpack.c.l.bf16 %v1332_v12  ;;  %v1334_v15 = vunpack.c.h.bf16 %v1332_v12  ;;  %v1337_v18 = vunpack.c.l.bf16 %v1403_v16  ;;  %v1338_v19 = vunpack.c.h.bf16 %v1403_v16  ;;  %v1405_v23 = vld [vmem:[%s1696_s21 + $0x18] sm:$0xff]   ;;  %v1406_v38 = vld [vmem:[%s1696_s21 + $0x20] sm:$0xff]   ;;  %v1407_v52 = vld [vmem:[%s1696_s21 + $0x28] sm:$0xff]  }
  0x12   : > { %v1341_v27 = vunpack.c.l.bf16 %v1404_v22  ;;  %v1342_v28 = vunpack.c.h.bf16 %v1404_v22  ;;  %v1345_v32 = vunpack.c.l.bf16 %v1405_v23  ;;  %v1346_v33 = vunpack.c.h.bf16 %v1405_v23  ;;  %v1408_v63 = vld [vmem:[%s1696_s21 + $0x30] sm:$0xff]   ;;  %v1604_v23 = vld [vmem:[%s1923_s3 + $0x98] sm:$0xff]  }
  0x13   : > { %1472 = vmatpush3.bf16.msra.mxu0 %v1591_v6  ;;  %v284_v20 = vmul.f32 %v1333_v14, %v1708_v13  ;;  %v285_v21 = vmul.f32 %v1334_v15, %v1708_v13  ;;  %v286_v25 = vmul.f32 %v1337_v18, %v1708_v13  ;;  %v287_v26 = vmul.f32 %v1338_v19, %v1708_v13  ;;  %v1603_v12 = vld [vmem:[%s1923_s3 + $0x90] sm:$0xff]  }
  0x14   : > { %1504 = vmatpush3.bf16.msra.mxu1 %v1592_v7  ;;  %1473 = vmatprep.subr.bf16.mxu0 %v1593_v8  ;;  %v288_v36 = vmul.f32 %v1341_v27, %v1708_v13  ;;  %v289_v37 = vmul.f32 %v1342_v28, %v1708_v13  ;;  %v290_v41 = vmul.f32 %v1345_v32, %v1708_v13  ;;  %v1349_v48 = vunpack.c.l.bf16 %v1406_v38 }
  0x15   : > { %1505 = vmatprep.subr.bf16.mxu1 %v1594_v9  ;;  %v307_v30 = vadd.f32 %v1714_v17, %v284_v20  ;;  %v308_v31 = vadd.f32 %v1714_v17, %v285_v21  ;;  %v309_v34 = vadd.f32 %v1714_v17, %v286_v25  ;;  %v310_v35 = vadd.f32 %v1714_v17, %v287_v26 }
  0x16   : > { %v311_v43 = vadd.f32 %v1714_v17, %v288_v36  ;;  %v312_v44 = vadd.f32 %v1714_v17, %v289_v37  ;;  %v291_v45 = vmul.f32 %v1346_v33, %v1708_v13  ;;  %v1350_v51 = vunpack.c.h.bf16 %v1406_v38 }
  0x17   : > { %1474 = vmatpush3.bf16.msra.mxu0 %v1593_v8  ;;  %v323_v39 = vmax.f32 %v307_v30, 0.0  ;;  %v324_v40 = vmax.f32 %v308_v31, 0.0  ;;  %v325_v49 = vmax.f32 %v309_v34, 0.0  ;;  %v326_v50 = vmax.f32 %v310_v35, 0.0  ;;  %v1605_v31 = vld [vmem:[%s1923_s3 + $0xa0] sm:$0xff]  }
  0x18   : > { %1506 = vmatpush3.bf16.msra.mxu1 %v1594_v9  ;;  %1475 = vmatprep.subr.bf16.mxu0 %v1595_v10  ;;  %v327_v54 = vmax.f32 %v311_v43, 0.0  ;;  %v328_v55 = vmax.f32 %v312_v44, 0.0  ;;  %v313_v56 = vadd.f32 %v1714_v17, %v290_v41  ;;  %v314_v57 = vadd.f32 %v1714_v17, %v291_v45  ;;  %v1608_v41 = vld [vmem:[%s1923_s3 + $0xb8] sm:$0xff]  }
  0x19   : > { %1507 = vmatprep.subr.bf16.mxu1 %v1596_v11  ;;  %v1745_v47 = vpack.c.bf16 %v324_v40, %v323_v39  ;;  %v292_v58 = vmul.f32 %v1349_v48, %v1708_v13  ;;  %v293_v59 = vmul.f32 %v1350_v51, %v1708_v13  ;;  %v1757_v60 = vpack.c.bf16 %v326_v50, %v325_v49 }
  0x1a   : > { %v1353_v61 = vunpack.c.l.bf16 %v1407_v52  ;;  %v1354_v62 = vunpack.c.h.bf16 %v1407_v52  ;;  %v1763_v1 = vpack.c.bf16 %v328_v55, %v327_v54  ;;  %v329_v2 = vmax.f32 %v313_v56, 0.0 }
  0x1b   : > { %1476 = vmatpush3.bf16.msra.mxu0 %v1595_v10  ;;  %1481 = vmatprep.mubr.bf16.mxu0 %v1745_v47  ;;  %v330_v3 = vmax.f32 %v314_v57, 0.0  ;;  %v315_v4 = vadd.f32 %v1714_v17, %v292_v58  ;;  %v316_v5 = vadd.f32 %v1714_v17, %v293_v59  ;;  %v1357_v6 = vunpack.c.l.bf16 %v1408_v63  ;;  %v1409_v10 = vld [vmem:[%s1696_s21 + $0x38] sm:$0xff]  }
  0x1c   : > { %1508 = vmatpush3.bf16.msra.mxu1 %v1596_v11  ;;  %1477 = vmatprep.subr.bf16.mxu0 %v1597_v24  ;;  %v1358_v7 = vunpack.c.h.bf16 %v1408_v63  ;;  %v294_v8 = vmul.f32 %v1353_v61, %v1708_v13  ;;  %v295_v9 = vmul.f32 %v1354_v62, %v1708_v13  ;;  %v1361_v21 = vunpack.c.l.bf16 %v1409_v10 }
  0x1d   : > { %1509 = vmatprep.subr.bf16.mxu1 %v1598_v29  ;;  %1513 = vmatprep.mubr.bf16.mxu1 %v1745_v47  ;;  %v1772_v11 = vpack.c.bf16 %v330_v3, %v329_v2  ;;  %v331_v14 = vmax.f32 %v315_v4, 0.0  ;;  %v332_v15 = vmax.f32 %v316_v5, 0.0  ;;  %v296_v16 = vmul.f32 %v1357_v6, %v1708_v13 }
  0x1e   : > { %v297_v18 = vmul.f32 %v1358_v7, %v1708_v13  ;;  %v317_v19 = vadd.f32 %v1714_v17, %v294_v8  ;;  %v318_v20 = vadd.f32 %v1714_v17, %v295_v9  ;;  %v1362_v22 = vunpack.c.h.bf16 %v1409_v10 }
  0x1f   : > { %1478 = vmatpush3.bf16.msra.mxu0 %v1597_v24  ;;  %v343_v24 = vpack.c.bf16 %v332_v15, %v331_v14  ;;  %v319_v25 = vadd.f32 %v1714_v17, %v296_v16 }
  0x20   : > { %1510 = vmatpush3.bf16.msra.mxu1 %v1598_v29  ;;  %1479 = vmatprep.subr.bf16.mxu0 %v1599_v42  ;;  %v320_v26 = vadd.f32 %v1714_v17, %v297_v18  ;;  %v333_v27 = vmax.f32 %v317_v19, 0.0  ;;  %v334_v28 = vmax.f32 %v318_v20, 0.0  ;;  %v298_v29 = vmul.f32 %v1361_v21, %v1708_v13 }
  0x21   : > { %1511 = vmatprep.subr.bf16.mxu1 %v1600_v46  ;;  %v299_v30 = vmul.f32 %v1362_v22, %v1708_v13  ;;  %v335_v32 = vmax.f32 %v319_v25, 0.0  ;;  %v1606_v13 = vld [vmem:[%s1923_s3 + $0xa8] sm:$0xff]  }
  0x22   : > { %v336_v33 = vmax.f32 %v320_v26, 0.0  ;;  %v344_v34 = vpack.c.bf16 %v334_v28, %v333_v27  ;;  %v321_v35 = vadd.f32 %v1714_v17, %v298_v29 }
  0x23   : > { %1480 = vmatpush3.bf16.msra.mxu0 %v1599_v42  ;;  %v322_v36 = vadd.f32 %v1714_v17, %v299_v30  ;;  %v1607_v17 = vld [vmem:[%s1923_s3 + $0xb0] sm:$0xff]  }
  0x24   : > { %1512 = vmatpush3.bf16.msra.mxu1 %v1600_v46  ;;  %1529 = vmatprep.subr.bf16.mxu0 %v1601_v53  ;;  %v345_v37 = vpack.c.bf16 %v336_v33, %v335_v32  ;;  %v337_v38 = vmax.f32 %v321_v35, 0.0 }
  0x25   : > { %1561 = vmatprep.subr.bf16.mxu1 %v1601_v53  ;;  %v338_v39 = vmax.f32 %v322_v36, 0.0 }
  0x26   : > { %1482 = vmatmul.mubr.bf16.vlgmr.msra.gmra.mrb[0].mxu0 %v1757_v60 }
  0x27   : > { %1514 = vmatmul.mubr.bf16.vlgmr.msra.gmra.mrb[0].mxu1 %v1757_v60  ;;  %1530 = vmatpush3.bf16.msra.mxu0 %v1601_v53  ;;  %v346_v40 = vpack.c.bf16 %v338_v39, %v337_v38 }
  0x28   : > { %1569 = vmatpush3.bf16.msra.mxu1 %v1601_v53  ;;  %1531 = vmatprep.subr.bf16.mxu0 %v1602_v0 }
  0x29   : > { %1562 = vmatprep.subr.bf16.mxu1 %v1602_v0  ;;  %1485 = vmatprep.mubr.bf16.mxu0 %v1763_v1 }
  0x2a   : > { %1517 = vmatprep.mubr.bf16.mxu1 %v1763_v1 }
  0x2b   : > { %1532 = vmatpush3.bf16.msra.mxu0 %v1602_v0 }
  0x2c   : > { %1570 = vmatpush3.bf16.msra.mxu1 %v1602_v0  ;;  %1533 = vmatprep.subr.bf16.mxu0 %v1603_v12 }
  0x2d   : > { %1563 = vmatprep.subr.bf16.mxu1 %v1603_v12 }
  0x2e   : > { %1486 = vmatmul.mubr.bf16.gmra.mrb[4].mxu0 %v1772_v11 }
  0x2f   : > { %1518 = vmatmul.mubr.bf16.gmra.mrb[4].mxu1 %v1772_v11  ;;  %1534 = vmatpush3.bf16.msra.mxu0 %v1603_v12 }
  0x30   : > { %1571 = vmatpush3.bf16.msra.mxu1 %v1603_v12  ;;  %1535 = vmatprep.subr.bf16.mxu0 %v1604_v23 }
  0x31   : > { %1564 = vmatprep.subr.bf16.mxu1 %v1604_v23  ;;  %1489 = vmatprep.mubr.bf16.mxu0 %v343_v24 }
  0x32   : > { %1521 = vmatprep.mubr.bf16.mxu1 %v343_v24 }
  0x33   : > { %1536 = vmatpush3.bf16.msra.mxu0 %v1604_v23 }
  0x34   : > { %1572 = vmatpush3.bf16.msra.mxu1 %v1604_v23  ;;  %1537 = vmatprep.subr.bf16.mxu0 %v1605_v31 }
  0x35   : > { %1565 = vmatprep.subr.bf16.mxu1 %v1605_v31 }
  0x36   : > { %1490 = vmatmul.mubr.bf16.gmra.mrb[8].mxu0 %v344_v34 }
  0x37   : > { %1522 = vmatmul.mubr.bf16.gmra.mrb[8].mxu1 %v344_v34  ;;  %1538 = vmatpush3.bf16.msra.mxu0 %v1605_v31 }
  0x38   : > { %1573 = vmatpush3.bf16.msra.mxu1 %v1605_v31  ;;  %1539 = vmatprep.subr.bf16.mxu0 %v1606_v13 }
  0x39   : > { %1566 = vmatprep.subr.bf16.mxu1 %v1606_v13  ;;  %1493 = vmatprep.mubr.bf16.mxu0 %v345_v37 }
  0x3a   : > { %1525 = vmatprep.mubr.bf16.mxu1 %v345_v37 }
  0x3b   : > { %1540 = vmatpush3.bf16.msra.mxu0 %v1606_v13 }
  0x3c   : > { %1574 = vmatpush3.bf16.msra.mxu1 %v1606_v13  ;;  %1541 = vmatprep.subr.bf16.mxu0 %v1607_v17 }
  0x3d   : > { %1567 = vmatprep.subr.bf16.mxu1 %v1607_v17 }
  0x3e   : > { %1494 = vmatmul.mubr.bf16.gmra.mrb[12].mxu0 %v346_v40 }
  0x3f   : > { %1526 = vmatmul.mubr.bf16.gmra.mrb[12].mxu1 %v346_v40  ;;  %1542 = vmatpush3.bf16.msra.mxu0 %v1607_v17 }
  0x40   : > { %1575 = vmatpush3.bf16.msra.mxu1 %v1607_v17  ;;  %1543 = vmatprep.subr.bf16.mxu0 %v1608_v41 }
  0x41   : > { %1568 = vmatprep.subr.bf16.mxu1 %v1608_v41  ;;  %1545 = vmatprep.mubr.bf16.mxu0 %v1745_v47 }
  0x42   : > { %1553 = vmatprep.mubr.bf16.mxu1 %v343_v24 }
  0x43   : > { %1544 = vmatpush3.bf16.msra.mxu0 %v1608_v41 }
  0x44   : > { %1576 = vmatpush3.bf16.msra.mxu1 %v1608_v41 }
  0x46   : > { %1546 = vmatmul.mubr.bf16.vlgmr.msra.gmra.mrb[16].mxu0 %v1757_v60 }
  0x47   : > { %1554 = vmatmul.mubr.bf16.vlgmr.msra.gmra.mrb[16].mxu1 %v344_v34  ;;  %1549 = vmatprep.mubr.bf16.mxu0 %v1763_v1 }
  0x48   : > { %1557 = vmatprep.mubr.bf16.mxu1 %v345_v37 }
  0x4e   : > { %1550 = vmatmul.mubr.bf16.gmra.mrb[20].mxu0 %v1772_v11 }
  0x4f   : > { %1558 = vmatmul.mubr.bf16.gmra.mrb[20].mxu1 %v346_v40 }
  0xf9   : > { %v1483_v42 = vpop.f32.mrb[0].mxu0 }
  0xfa   : > { %v852_v43 = vrot.slane %v1483_v42, 7  ;;  %v445_v44 = vpop.f32.mrb[1].mxu0  ;;  %v1515_v45 = vpop.f32.mrb[0].mxu1 }
  0xfb   : > { %v849_v46 = vrot.slane %v445_v44, 7  ;;  %v1484_v48 = vpop.f32.mrb[2].mxu0  ;;  %v607_v47 = vpop.f32.mrb[1].mxu1 }
  0xfc   : > { %v853_v49 = vrot.slane %v1484_v48, 7  ;;  %v448_v50 = vpop.f32.mrb[3].mxu0  ;;  %v890_v51 = vsel %vm848_vm0, 0.0, %v852_v43  ;;  %v1516_v52 = vpop.f32.mrb[2].mxu1 }
  0xfd   : > { %v850_v53 = vrot.slane %v448_v50, 7  ;;  %v1811_v54 = vadd.f32 %v1515_v45, %v890_v51  ;;  %v889_v55 = vsel %vm848_vm0, 0.0, %v849_v46  ;;  %v610_v56 = vpop.f32.mrb[3].mxu1 }
  0xfe   : > { %v1814_v57 = vadd.f32 %v889_v55, %v607_v47  ;;  %v854_v58 = vsel %vm848_vm0, %v852_v43, %v853_v49 }
  0xff   : > { %v1817_v59 = vadd.f32 %v1516_v52, %v854_v58  ;;  %v851_v60 = vsel %vm848_vm0, %v849_v46, %v850_v53 }
 0x100   : > { %v1820_v61 = vadd.f32 %v851_v60, %v610_v56 }
 0x101   : > { %v1487_v62 = vpop.f32.mrb[4].mxu0 }
 0x102   : > { %v858_v63 = vrot.slane %v1487_v62, 7  ;;  %v461_v0 = vpop.f32.mrb[5].mxu0  ;;  %v1519_v1 = vpop.f32.mrb[4].mxu1 }
 0x103   : > { %v855_v2 = vrot.slane %v461_v0, 7  ;;  %v1488_v3 = vpop.f32.mrb[6].mxu0  ;;  %v623_v4 = vpop.f32.mrb[5].mxu1 }
 0x104   : > { %v859_v5 = vrot.slane %v1488_v3, 7  ;;  %v464_v6 = vpop.f32.mrb[7].mxu0  ;;  %v892_v7 = vsel %vm848_vm0, 0.0, %v858_v63  ;;  %v1520_v8 = vpop.f32.mrb[6].mxu1 }
 0x105   : > { %v856_v9 = vrot.slane %v464_v6, 7  ;;  %v1823_v10 = vadd.f32 %v1519_v1, %v892_v7  ;;  %v891_v11 = vsel %vm848_vm0, 0.0, %v855_v2  ;;  %v626_v12 = vpop.f32.mrb[7].mxu1 }
 0x106   : > { %v1826_v14 = vadd.f32 %v891_v11, %v623_v4  ;;  %v860_v15 = vsel %vm848_vm0, %v858_v63, %v859_v5 }
 0x107   : > { %v1829_v16 = vadd.f32 %v1520_v8, %v860_v15  ;;  %v857_v18 = vsel %vm848_vm0, %v855_v2, %v856_v9 }
 0x108   : > { %v1832_v19 = vadd.f32 %v857_v18, %v626_v12 }
 0x109   : > { %v1491_v20 = vpop.f32.mrb[8].mxu0 }
 0x10a   : > { %v864_v21 = vrot.slane %v1491_v20, 7  ;;  %v477_v22 = vpop.f32.mrb[9].mxu0  ;;  %v1523_v23 = vpop.f32.mrb[8].mxu1 }
 0x10b   : > { %v861_v24 = vrot.slane %v477_v22, 7  ;;  %v1492_v25 = vpop.f32.mrb[10].mxu0  ;;  %v639_v26 = vpop.f32.mrb[9].mxu1 }
 0x10c   : > { %v865_v27 = vrot.slane %v1492_v25, 7  ;;  %v480_v28 = vpop.f32.mrb[11].mxu0  ;;  %v894_v29 = vsel %vm848_vm0, 0.0, %v864_v21  ;;  %v1524_v30 = vpop.f32.mrb[10].mxu1 }
 0x10d   : > { %v862_v31 = vrot.slane %v480_v28, 7  ;;  %v972_v32 = vadd.f32 %v1523_v23, %v894_v29  ;;  %v893_v33 = vsel %vm848_vm0, 0.0, %v861_v24  ;;  %v642_v34 = vpop.f32.mrb[11].mxu1 }
 0x10e   : > { %v1836_v35 = vadd.f32 %v893_v33, %v639_v26  ;;  %v866_v36 = vsel %vm848_vm0, %v864_v21, %v865_v27 }
 0x10f   : > { %v973_v13 = vadd.f32 %v1524_v30, %v866_v36  ;;  %v863_v37 = vsel %vm848_vm0, %v861_v24, %v862_v31 }
 0x110   : > { %v1840_v38 = vadd.f32 %v863_v37, %v642_v34 }
 0x111   : > { %v1495_v39 = vpop.f32.mrb[12].mxu0 }
 0x112   : > { %v870_v17 = vrot.slane %v1495_v39, 7  ;;  %v493_v40 = vpop.f32.mrb[13].mxu0  ;;  %v1527_v41 = vpop.f32.mrb[12].mxu1 }
 0x113   : > { %v867_v42 = vrot.slane %v493_v40, 7  ;;  %v1496_v43 = vpop.f32.mrb[14].mxu0  ;;  %v655_v44 = vpop.f32.mrb[13].mxu1 }
 0x114   : > { %v871_v45 = vrot.slane %v1496_v43, 7  ;;  %v496_v46 = vpop.f32.mrb[15].mxu0  ;;  %v896_v48 = vsel %vm848_vm0, 0.0, %v870_v17  ;;  %v1528_v47 = vpop.f32.mrb[14].mxu1 }
 0x115   : > { %v868_v49 = vrot.slane %v496_v46, 7  ;;  %v1843_v50 = vadd.f32 %v1527_v41, %v896_v48  ;;  %v895_v51 = vsel %vm848_vm0, 0.0, %v867_v42  ;;  %v658_v52 = vpop.f32.mrb[15].mxu1 }
 0x116   : > { %v1846_v53 = vadd.f32 %v895_v51, %v655_v44  ;;  %v872_v55 = vsel %vm848_vm0, %v870_v17, %v871_v45 }
 0x117   : > { %v1849_v56 = vadd.f32 %v1528_v47, %v872_v55  ;;  %v869_v58 = vsel %vm848_vm0, %v867_v42, %v868_v49 }
 0x118   : > { %v1852_v60 = vadd.f32 %v869_v58, %v658_v52 }
 0x119   : > { %v1547_v62 = vpop.f32.mrb[16].mxu0 }
 0x11a   : > { %v1555_v63 = vpop.f32.mrb[16].mxu1  ;;  %v769_v0 = vpop.f32.mrb[17].mxu0  ;;  %v917_v4 = vrot.slane %v1547_v62, 1 }
 0x11b   : > { %v929_v1 = vrot.slane %v1555_v63, 1  ;;  %v801_v2 = vpop.f32.mrb[17].mxu1  ;;  %v1548_v3 = vpop.f32.mrb[18].mxu0  ;;  %v914_v8 = vrot.slane %v769_v0, 1 }
 0x11c   : > { %v918_v5 = vrot.slane %v1548_v3, 1  ;;  %v1556_v6 = vpop.f32.mrb[18].mxu1  ;;  %v772_v7 = vpop.f32.mrb[19].mxu0  ;;  %v926_v15 = vrot.slane %v801_v2, 1 }
 0x11d   : > { %v930_v9 = vrot.slane %v1556_v6, 1  ;;  %v915_v11 = vrot.slane %v772_v7, 1  ;;  %v804_v12 = vpop.f32.mrb[19].mxu1 }
 0x11e   : > { %v919_v18 = vsel %vm913_vm1, %v917_v4, %v918_v5  ;;  %v955_v20 = vsel %vm913_vm1, %v918_v5, 0.0  ;;  %v927_v21 = vrot.slane %v804_v12, 1 }
 0x11f   : > { %v980_v22 = vadd.f32 %v1811_v54, %v919_v18  ;;  %v981_v23 = vadd.f32 %v1817_v59, %v955_v20  ;;  %v931_v24 = vsel %vm913_vm1, %v929_v1, %v930_v9  ;;  %v959_v25 = vsel %vm913_vm1, %v930_v9, 0.0 }
 0x120   : > { %v1867_v26 = vadd.f32 %v972_v32, %v931_v24  ;;  %v1869_v27 = vadd.f32 %v973_v13, %v959_v25  ;;  %v916_v54 = vsel %vm913_vm1, %v914_v8, %v915_v11  ;;  %v954_v59 = vsel %vm913_vm1, %v915_v11, 0.0 }
 0x121   : > { %v1371_v28 = vpack.c.bf16 %v981_v23, %v980_v22  ;;  %v978_v29 = vadd.f32 %v1814_v57, %v916_v54  ;;  %v1551_v30 = vpop.f32.mrb[20].mxu0  ;;  %v979_v33 = vadd.f32 %v1820_v61, %v954_v59  ;;  %v928_v13 = vsel %vm913_vm1, %v926_v15, %v927_v21 }
 0x122   : > { %v1391_v31 = vpack.c.bf16 %v1869_v27, %v1867_v26  ;;  %v1559_v34 = vpop.f32.mrb[20].mxu1  ;;  %v785_v36 = vpop.f32.mrb[21].mxu0  ;;  %v958_v37 = vsel %vm913_vm1, %v927_v21, 0.0  ;;  %v986_v42 = vadd.f32 %v1836_v35, %v928_v13  ;;  %v1017_v61 = vmul.f32 %v980_v22, %v980_v22 }
 0x123   : > { %1410 = vst [vmem:[%s1865_s11 + $0x8] sm:$0xff] %v1371_v28   ;;  %v1015_v32 = vmul.f32 %v978_v29, %v978_v29  ;;  %v817_v39 = vpop.f32.mrb[21].mxu1  ;;  %v1552_v17 = vpop.f32.mrb[22].mxu0  ;;  %v994_v40 = vadd.f32 %v979_v33, %v978_v29  ;;  %v1016_v57 = vmul.f32 %v979_v33, %v979_v33  ;;  %v1366_v41 = vpack.c.bf16 %v979_v33, %v978_v29 }
 0x124   : > { %1414 = vst [vmem:[%s1865_s11 + $0x28] sm:$0xff] %v1391_v31   ;;  %v1560_v43 = vpop.f32.mrb[22].mxu1  ;;  %v788_v44 = vpop.f32.mrb[23].mxu0  ;;  %v987_v45 = vadd.f32 %v1840_v38, %v958_v37  ;;  %v935_v46 = vrot.slane %v1559_v34, 1  ;;  %v923_v51 = vrot.slane %v1551_v30, 1  ;;  %v924_v52 = vrot.slane %v1552_v17, 1 }
 0x125   : > { %v820_v48 = vpop.f32.mrb[23].mxu1  ;;  %v995_v47 = vadd.f32 %v994_v40, %v980_v22  ;;  %v1031_v49 = vadd.f32 %v1016_v57, %v1015_v32  ;;  %1367 = vst [vmem:[%s1865_s11] sm:$0xff] %v1366_v41   ;;  %v920_v58 = vrot.slane %v785_v36, 1  ;;  %v936_v62 = vrot.slane %v1560_v43, 1 }
 0x126   : > { %v1386_v55 = vpack.c.bf16 %v987_v45, %v986_v42  ;;  %v921_v63 = vrot.slane %v788_v44, 1  ;;  %v925_v35 = vsel %vm913_vm1, %v923_v51, %v924_v52  ;;  %v957_v1 = vsel %vm913_vm1, %v924_v52, 0.0 }
 0x127   : > { %v1032_v0 = vadd.f32 %v1031_v49, %v1017_v61  ;;  %v996_v2 = vadd.f32 %v995_v47, %v981_v23  ;;  %v984_v38 = vadd.f32 %v1823_v10, %v925_v35  ;;  %v985_v3 = vadd.f32 %v1829_v16, %v957_v1 }
 0x128   : > { %1413 = vst [vmem:[%s1865_s11 + $0x20] sm:$0xff] %v1386_v55   ;;  %v937_v4 = vsel %vm913_vm1, %v935_v46, %v936_v62  ;;  %v961_v5 = vsel %vm913_vm1, %v936_v62, 0.0  ;;  %v922_v8 = vsel %vm913_vm1, %v920_v58, %v921_v63  ;;  %v956_v9 = vsel %vm913_vm1, %v921_v63, 0.0 }
 0x129   : > { %v992_v6 = vadd.f32 %v1843_v50, %v937_v4  ;;  %v993_v7 = vadd.f32 %v1849_v56, %v961_v5  ;;  %v1018_v11 = vmul.f32 %v981_v23, %v981_v23  ;;  %v932_v12 = vrot.slane %v817_v39, 1 }
 0x12a   : > { %v1381_v15 = vpack.c.bf16 %v985_v3, %v984_v38  ;;  %v982_v10 = vadd.f32 %v1826_v14, %v922_v8  ;;  %v983_v18 = vadd.f32 %v1832_v19, %v956_v9  ;;  %v933_v50 = vrot.slane %v820_v48, 1 }
 0x12b   : > { %v1401_v16 = vpack.c.bf16 %v993_v7, %v992_v6  ;;  %v1033_v22 = vadd.f32 %v1032_v0, %v1018_v11  ;;  %v1021_v28 = vmul.f32 %v984_v38, %v984_v38  ;;  %v1022_v33 = vmul.f32 %v985_v3, %v985_v3 }
 0x12c   : > { %1412 = vst [vmem:[%s1865_s11 + $0x18] sm:$0xff] %v1381_v15   ;;  %v997_v20 = vadd.f32 %v996_v2, %v982_v10  ;;  %v1019_v21 = vmul.f32 %v982_v10, %v982_v10  ;;  %v1020_v56 = vmul.f32 %v983_v18, %v983_v18  ;;  %v1376_v24 = vpack.c.bf16 %v983_v18, %v982_v10 }
 0x12d   : > { %1416 = vst [vmem:[%s1865_s11 + $0x38] sm:$0xff] %v1401_v16   ;;  %v934_v23 = vsel %vm913_vm1, %v932_v12, %v933_v50  ;;  %v960_v59 = vsel %vm913_vm1, %v933_v50, 0.0  ;;  %v1023_v32 = vmul.f32 %v986_v42, %v986_v42  ;;  %v1024_v39 = vmul.f32 %v987_v45, %v987_v45 }
 0x12e   : > { %v998_v25 = vadd.f32 %v997_v20, %v983_v18  ;;  %v1034_v54 = vadd.f32 %v1033_v22, %v1019_v21  ;;  %1411 = vst [vmem:[%s1865_s11 + $0x10] sm:$0xff] %v1376_v24   ;;  %v990_v14 = vadd.f32 %v1846_v53, %v934_v23  ;;  %v991_v19 = vadd.f32 %v1852_v60, %v960_v59 }
 0x12f   : > { %v1025_v57 = vmul.f32 %v1867_v26, %v1867_v26  ;;  %v1026_v41 = vmul.f32 %v1869_v27, %v1869_v27  ;;  %v1029_v49 = vmul.f32 %v992_v6, %v992_v6  ;;  %v1030_v55 = vmul.f32 %v993_v7, %v993_v7 }
 0x130   : > { %v999_v29 = vadd.f32 %v998_v25, %v984_v38  ;;  %v1035_v30 = vadd.f32 %v1034_v54, %v1020_v56  ;;  %v1396_v31 = vpack.c.bf16 %v991_v19, %v990_v14  ;;  %v1027_v46 = vmul.f32 %v990_v14, %v990_v14 }
 0x131   : > { %v1028_v47 = vmul.f32 %v991_v19, %v991_v19 }
 0x132   : > { %v1000_v34 = vadd.f32 %v999_v29, %v985_v3  ;;  %v1036_v36 = vadd.f32 %v1035_v30, %v1021_v28  ;;  %1415 = vst [vmem:[%s1865_s11 + $0x30] sm:$0xff] %v1396_v31  }
 0x134   : > { %v1001_v13 = vadd.f32 %v1000_v34, %v986_v42  ;;  %v1037_v37 = vadd.f32 %v1036_v36, %v1022_v33 }
 0x136   : > { %v1038_v17 = vadd.f32 %v1037_v37, %v1023_v32  ;;  %v1002_v40 = vadd.f32 %v1001_v13, %v987_v45 }
 0x138   : > { %v1003_v53 = vadd.f32 %v1002_v40, %v1867_v26  ;;  %v1039_v60 = vadd.f32 %v1038_v17, %v1024_v39 }
 0x13a   : > { %v1004_v43 = vadd.f32 %v1003_v53, %v1869_v27  ;;  %v1040_v44 = vadd.f32 %v1039_v60, %v1025_v57 }
 0x13c   : > { %v1005_v61 = vadd.f32 %v1004_v43, %v990_v14  ;;  %v1041_v42 = vadd.f32 %v1040_v44, %v1026_v41 }
 0x13e   : > { %v1006_v48 = vadd.f32 %v1005_v61, %v991_v19  ;;  %v1042_v45 = vadd.f32 %v1041_v42, %v1027_v46 }
 0x140   : > { %v1007_v51 = vadd.f32 %v1006_v48, %v992_v6  ;;  %v1043_v52 = vadd.f32 %v1042_v45, %v1028_v47 }
 0x142   : > { %v1008_v26 = vadd.f32 %v1007_v51, %v993_v7  ;;  %v1044_v58 = vadd.f32 %v1043_v52, %v1029_v49 }
 0x144   : > { %v1009_v62 = vrot.slane %v1008_v26, 4  ;;  %v1045_v63 = vadd.f32 %v1044_v58, %v1030_v55 }
 0x146   : > { %v1010_v0 = vadd.f32 %v1009_v62, %v1008_v26  ;;  %v1046_v27 = vrot.slane %v1045_v63, 4 }
 0x148   : > { %v1011_v35 = vrot.slane %v1010_v0, 2  ;;  %v1047_v1 = vadd.f32 %v1046_v27, %v1045_v63 }
 0x14a   : > { %v1012_v2 = vadd.f32 %v1011_v35, %v1010_v0  ;;  %v1048_v38 = vrot.slane %v1047_v1, 2 }
 0x14c   : > { %v1013_v3 = vrot.slane %v1012_v2, 1  ;;  %v1049_v4 = vadd.f32 %v1048_v38, %v1047_v1 }
 0x14e   : > { %v1050_v5 = vrot.slane %v1049_v4, 1  ;;  %v1014_v8 = vadd.f32 %v1013_v3, %v1012_v2 }
 0x150   : > { %v1051_v6 = vadd.f32 %v1050_v5, %v1049_v4 }
 0x152   : > { %v1052_v7 = vsel %vm848_vm0, %v1014_v8, %v1051_v6 }
 0x153   : > { %v1054_v9 = vsel %vm1053_vm2, %v1052_v7, 0.0 }
 0x154   : > { %1055 = vst [vmem:[%s243_s14] sm:$0xff] %v1054_v9 }
 0x155 PF: > { %s16_s18 = sadd.s32 1, %s1615_s18  }
 0x156   : > { %p13_p5 = scmp.ge.s32.totalorder %s16_s18, 4  }
 0x158   :  { %15 = sbr.rel (!%p13_p5) target bundleno = 1 (0x1), region = 80 }

</bundles_post_ra>
